<compile_context>
chip_gen: v7x
topology: tpu7x:2x2x1
jax: 0.10.0
libtpu: 0.0.40
codegen_flags: <defaults>
</compile_context>

<pallas_src>
import functools

import jax
import jax.numpy as jnp
import numpy as np
from jax.experimental import pallas as pl
from jax.experimental.pallas import tpu as pltpu


def block_kernel(x_ref, w1_ref, b1_ref, gamma_ref, beta_ref, w2_ref, b2_ref,
                 pool_ref, out_ref, sum_ref, sumsq_ref, *stash_refs,
                 use_stash, seg_len, window, pad, l1, count):
    """Fused Block forward for one batch tile (B_TILE elements).

    Grid = (phase, batch tile):
      phase 0: conv1 -> stash y1, accumulate BN sum / sum-of-squares.
      phase 1: (stashed) y1 -> BN normalize -> ReLU -> conv2 -> ReLU
               -> avgpool -> store output tile.

    x_ref    : (T, Cin) bf16   T = B_TILE*seg_len zero-separated rows
    w1_ref   : (K*Cin, Ce) bf16  conv1 weight, im2col layout
    b1_ref, gamma_ref, beta_ref : (1, Ce) f32
    w2_ref   : (K*Ce, Co) bf16   conv2 weight, im2col layout
    b2_ref   : (1, Co) f32
    pool_ref : (B_TILE*M, T) f32 block-diagonal AvgPool matrix (built once)
    out_ref  : (B_TILE*M, Co) f32
    sum_ref, sumsq_ref : (1, Ce) f32 persistent accumulators
    stash_refs : optionally ((num_tiles, T, Ce) f32,) persistent y1 stash
    """
    phase = pl.program_id(0)
    n = pl.program_id(1)
    T, cin = x_ref.shape
    ce = w1_ref.shape[1]
    K = window
    stash_ref = stash_refs[0] if use_stash else None

    # Rows whose within-segment index is < L1 hold real conv outputs; the rest
    # are separator / alignment rows: masked out of the statistics and zeroed
    # before conv2 (where they double as conv2's 'same' zero padding).
    row = jax.lax.broadcasted_iota(jnp.int32, (T, 1), 0)
    valid = (row % seg_len) < l1

    def conv1():
        x = x_ref[...]                                            # (T, Cin) bf16
        xe = jnp.concatenate([x, jnp.zeros((K - 1, cin), x.dtype)], axis=0)
        cols = jnp.concatenate([xe[k:k + T, :] for k in range(K)], axis=1)
        return jnp.dot(cols, w1_ref[...],
                       preferred_element_type=jnp.float32) + b1_ref[...]

    # ---- Phase 0: conv1 + one-pass BN statistics ----------------------------
    @pl.when(phase == 0)
    def _():
        y1 = conv1()                                              # (T, Ce) f32
        if use_stash:
            stash_ref[n] = y1
        y1m = jnp.where(valid, y1, 0.0)

        @pl.when(n == 0)
        def _():
            sum_ref[...] = jnp.zeros_like(sum_ref)
            sumsq_ref[...] = jnp.zeros_like(sumsq_ref)

        sum_ref[...] += jnp.sum(y1m, axis=0, keepdims=True)
        sumsq_ref[...] += jnp.sum(y1m * y1m, axis=0, keepdims=True)

    # ---- Phase 1: normalize + ReLU + conv2 + ReLU + avgpool ------------------
    @pl.when(phase == 1)
    def _():
        y1 = stash_ref[n] if use_stash else conv1()               # (T, Ce) f32

        # BatchNorm1d (training mode): biased batch statistics over (N, L1).
        # TODO(synk): one-pass E[x^2]-mean^2 can cancel for huge N*L1; use a
        # two-pass over the stash / Welford for production sizes.
        inv_count = 1.0 / count
        mean = sum_ref[...] * inv_count
        var = jnp.maximum(sumsq_ref[...] * inv_count - mean * mean, 0.0)
        scale = jax.lax.rsqrt(var + 1e-5) * gamma_ref[...]
        shift = beta_ref[...] - mean * scale
        y1n = jnp.maximum(y1 * scale + shift, 0.0)
        y1n = jnp.where(valid, y1n, 0.0)                          # zero junk rows

        # Conv1d #2: shifting every segment down by `pad` rows turns the layout
        # into [pad zeros | y1n_b | >=pad zeros], i.e. 'same' padding again.
        parts = []
        if pad > 0:
            parts.append(jnp.zeros((pad, ce), jnp.float32))
        parts.append(y1n)
        if K - 1 - pad > 0:
            parts.append(jnp.zeros((K - 1 - pad, ce), jnp.float32))
        y1e = jnp.concatenate(parts, axis=0)                      # (T+K-1, Ce)
        cols2 = jnp.concatenate([y1e[k:k + T, :] for k in range(K)], axis=1)
        y2 = jnp.maximum(
            jnp.dot(cols2, w2_ref[...].astype(jnp.float32),
                    preferred_element_type=jnp.float32) + b2_ref[...], 0.0)

        # AvgPool1d(P, stride=P): one small matmul on the otherwise-idle MXU
        # against the precomputed block-diagonal pooling matrix; drops the
        # L2 % P tail exactly like nn.AvgPool1d.
        out_ref[...] = jnp.dot(pool_ref[...], y2,
                               preferred_element_type=jnp.float32
                               ).astype(out_ref.dtype)


@functools.partial(jax.jit,
                   static_argnames=("window", "pool_dim", "batch_tile"))
def block_forward(x, w1, b1, gamma, beta, w2, b2, *, window, pool_dim,
                  batch_tile=8):
    """Forward pass of `Block` for x of shape (N, L, input_dim).

    Weights use PyTorch layouts: w1 (Ce, Cin, K), w2 (Co, Ce, K),
    b1/gamma/beta (Ce,), b2 (Co,).
    """
    compute_dtype = jnp.bfloat16          # HBM activations / MXU operands
    N, L, cin = x.shape
    K = window
    pad = K // 2
    ce = w1.shape[0]
    co = w2.shape[0]
    l1 = L + 2 * pad - K + 1              # conv1 output length
    l2 = l1 + 2 * pad - K + 1             # conv2 output length
    m = l2 // pool_dim                    # pooled length (floor, like AvgPool1d)

    # Segment length per batch element (data + zero separators), rounded up to
    # a sublane multiple so every segment starts on an aligned boundary.
    seg = max(L, l1) + 2 * pad
    seg = ((seg + 7) // 8) * 8

    # Batch tile: largest divisor of N not exceeding `batch_tile`.
    bt = max(1, min(batch_tile, N))
    while N % bt:
        bt -= 1
    num_tiles = N // bt
    T = bt * seg

    # ---- one-time layout prep (XLA side, negligible) -------------------------
    # zero-separated channels-last input: (N, S, Cin) -> flat (N*S, Cin)
    xp = jnp.pad(x.astype(compute_dtype),
                 ((0, 0), (pad, seg - L - pad), (0, 0)))
    x_flat = xp.reshape(N * seg, cin)

    # conv weights: torch (Cout, Cin, K) -> im2col (K*Cin, Cout)
    w1_mat = jnp.transpose(w1, (2, 1, 0)).reshape(K * cin, ce).astype(compute_dtype)
    w2_mat = jnp.transpose(w2, (2, 1, 0)).reshape(K * ce, co).astype(compute_dtype)
    b1_row = b1.reshape(1, ce).astype(jnp.float32)
    g_row = gamma.reshape(1, ce).astype(jnp.float32)
    be_row = beta.reshape(1, ce).astype(jnp.float32)
    b2_row = b2.reshape(1, co).astype(jnp.float32)

    # Block-diagonal AvgPool matrix, built once (all shapes static under jit).
    pool_np = np.zeros((bt * m, T), np.float32)
    for b in range(bt):
        for mm in range(m):
            lo = b * seg + mm * pool_dim
            pool_np[b * m + mm, lo:lo + pool_dim] = 1.0 / pool_dim
    pool_mat = jnp.asarray(pool_np)

    # y1 stash keeps conv1 activations in VMEM between the two phases so x is
    # read from HBM exactly once and conv1 runs exactly once per element.
    stash_bytes = num_tiles * T * ce * 4
    use_stash = stash_bytes <= 16 * 1024 * 1024   # fits v5e/v6e/v7x comfortably
    # TODO(synk): store the stash in bf16 on v7x (64 MiB VMEM) to double reach.

    blocks_bytes = 4 * (T * cin * 2 + bt * m * co * 4)        # double-buffered io
    const_bytes = (w1_mat.size + w2_mat.size) * 2 + pool_mat.size * 4
    est = (stash_bytes if use_stash else 0) + blocks_bytes + const_bytes + T * ce * 16
    vmem_limit = int(min(max(2 * est, 32 * 1024 * 1024), 64 * 1024 * 1024))

    if use_stash:
        # phase 1 never touches x: pin its block index so it is not re-DMA'd.
        x_index_map = lambda p, n: (n * (1 - p) + (num_tiles - 1) * p, 0)
    else:
        x_index_map = lambda p, n: (n, 0)

    kernel = functools.partial(
        block_kernel, use_stash=use_stash, seg_len=seg, window=K, pad=pad,
        l1=l1, count=N * l1)

    scratch_shapes = [pltpu.VMEM((1, ce), jnp.float32),     # sum(y1)
                      pltpu.VMEM((1, ce), jnp.float32)]     # sum(y1*y1)
    if use_stash:
        scratch_shapes.append(pltpu.VMEM((num_tiles, T, ce), jnp.float32))

    out_flat = pl.pallas_call(
        kernel,
        grid=(2, num_tiles),   # (phase, batch tile); phase 0 = BN statistics
        in_specs=[
            pl.BlockSpec((T, cin), x_index_map),
            pl.BlockSpec((K * cin, ce), lambda p, n: (0, 0)),
            pl.BlockSpec((1, ce), lambda p, n: (0, 0)),
            pl.BlockSpec((1, ce), lambda p, n: (0, 0)),
            pl.BlockSpec((1, ce), lambda p, n: (0, 0)),
            pl.BlockSpec((K * ce, co), lambda p, n: (0, 0)),
            pl.BlockSpec((1, co), lambda p, n: (0, 0)),
            pl.BlockSpec((bt * m, T), lambda p, n: (0, 0)),
        ],
        # phase 0 never writes the output: pin it to block 0 so no stale VMEM
        # is written back to HBM during the statistics pass.
        out_specs=pl.BlockSpec((bt * m, co), lambda p, n: (n * p, 0)),
        out_shape=jax.ShapeDtypeStruct((N * m, co), jnp.float32),
        scratch_shapes=scratch_shapes,
        compiler_params=pltpu.CompilerParams(
            # BN statistics are a cross-batch reduction and phase 1 depends on
            # phase 0 -> sequential grid.
            # TODO(synk): split into a stats call + a batch-"parallel" apply
            # call to use both v7x TensorCores.
            dimension_semantics=("arbitrary", "arbitrary"),
            vmem_limit_bytes=vmem_limit),
    )(x_flat, w1_mat, b1_row, g_row, be_row, w2_mat, b2_row, pool_mat)

    return out_flat.reshape(N, m, co)


def reference_forward(x, w1, b1, gamma, beta, w2, b2, window, pool_dim):
    """Pure-JAX reference mirroring the PyTorch Block (training-mode BN).

    Matches the kernel's numerics: conv operands rounded to bf16, accumulation
    and everything else in f32.
    """
    pad = window // 2
    f32, bf = jnp.float32, jnp.bfloat16
    xc = x.astype(bf).astype(f32)
    w1c = jnp.transpose(w1.astype(bf).astype(f32), (2, 1, 0))     # (K, Cin, Ce)
    w2c = jnp.transpose(w2.astype(bf).astype(f32), (2, 1, 0))     # (K, Ce, Co)
    dn = ("NWC", "WIO", "NWC")

    y = jax.lax.conv_general_dilated(xc, w1c, (1,), [(pad, pad)],
                                     dimension_numbers=dn,
                                     preferred_element_type=f32)
    y = y + b1[None, None, :]
    mean = jnp.mean(y, axis=(0, 1), keepdims=True)
    var = jnp.mean(jnp.square(y - mean), axis=(0, 1), keepdims=True)
    y = (y - mean) * jax.lax.rsqrt(var + 1e-5) * gamma[None, None, :] \
        + beta[None, None, :]
    y = jnp.maximum(y, 0.0)
    y = jax.lax.conv_general_dilated(y, w2c, (1,), [(pad, pad)],
                                     dimension_numbers=dn,
                                     preferred_element_type=f32)
    y = jnp.maximum(y + b2[None, None, :], 0.0)
    l2 = y.shape[1]
    m = l2 // pool_dim
    y = y[:, :m * pool_dim, :].reshape(y.shape[0], m, pool_dim, y.shape[2])
    return y.mean(axis=2)


if __name__ == "__main__":
    # Block(input_dim=4, embed_dim=8, output_dim=8, window=3, maxpool_dim=4)
    N, L, Cin, Ce, Co = 8, 16, 4, 8, 8
    window, pool_dim = 3, 4

    key = jax.random.PRNGKey(0)
    ks = jax.random.split(key, 7)
    x = jax.random.normal(ks[0], (N, L, Cin), jnp.float32)
    # PyTorch Conv1d weight layout: (out_channels, in_channels, kernel_size)
    w1 = 0.3 * jax.random.normal(ks[1], (Ce, Cin, window), jnp.float32)
    b1 = 0.1 * jax.random.normal(ks[2], (Ce,), jnp.float32)
    gamma = 1.0 + 0.1 * jax.random.normal(ks[3], (Ce,), jnp.float32)
    beta = 0.1 * jax.random.normal(ks[4], (Ce,), jnp.float32)
    w2 = 0.3 * jax.random.normal(ks[5], (Co, Ce, window), jnp.float32)
    b2 = 0.1 * jax.random.normal(ks[6], (Co,), jnp.float32)

    out = block_forward(x, w1, b1, gamma, beta, w2, b2,
                        window=window, pool_dim=pool_dim, batch_tile=4)
    out = jax.block_until_ready(out)
    assert out.shape == (N, L // pool_dim, Co), out.shape

    ref = reference_forward(x, w1, b1, gamma, beta, w2, b2, window, pool_dim)
    np.testing.assert_allclose(np.asarray(out), np.asarray(ref),
                               rtol=1e-3, atol=1e-3)
    print("KERNEL_OK")
</pallas_src>

<mosaic_0001>
module attributes {stable_mosaic.version = 11 : i64} {
  func.func @block_kernel(%arg0: i32, %arg1: i32, %arg2: memref<96x4xbf16, #tpu.memory_space<vmem>>, %arg3: memref<12x8xbf16, #tpu.memory_space<vmem>>, %arg4: memref<1x8xf32, #tpu.memory_space<vmem>>, %arg5: memref<1x8xf32, #tpu.memory_space<vmem>>, %arg6: memref<1x8xf32, #tpu.memory_space<vmem>>, %arg7: memref<24x8xbf16, #tpu.memory_space<vmem>>, %arg8: memref<1x8xf32, #tpu.memory_space<vmem>>, %arg9: memref<16x96xf32, #tpu.memory_space<vmem>>, %arg10: memref<16x8xf32, #tpu.memory_space<vmem>>, %arg11: memref<1x8xf32, #tpu.memory_space<vmem>>, %arg12: memref<1x8xf32, #tpu.memory_space<vmem>>, %arg13: memref<2x96x8xf32, #tpu.memory_space<vmem>>) attributes {dimension_semantics = [#tpu.dimension_semantics<arbitrary>, #tpu.dimension_semantics<arbitrary>], iteration_bounds = array<i64: 2, 2>, scalar_prefetch = 0 : i64, scratch_operands = 3 : i64, tpu.core_type = #tpu.core_type<tc>, window_params = [{transform_indices = @transform_0, window_bounds = array<i64: 96, 4>}, {pipeline_mode = #tpu.pipeline_mode<synchronous>, transform_indices = @transform_1, window_bounds = array<i64: 12, 8>}, {pipeline_mode = #tpu.pipeline_mode<synchronous>, transform_indices = @transform_2, window_bounds = array<i64: 1, 8>}, {pipeline_mode = #tpu.pipeline_mode<synchronous>, transform_indices = @transform_3, window_bounds = array<i64: 1, 8>}, {pipeline_mode = #tpu.pipeline_mode<synchronous>, transform_indices = @transform_4, window_bounds = array<i64: 1, 8>}, {pipeline_mode = #tpu.pipeline_mode<synchronous>, transform_indices = @transform_5, window_bounds = array<i64: 24, 8>}, {pipeline_mode = #tpu.pipeline_mode<synchronous>, transform_indices = @transform_6, window_bounds = array<i64: 1, 8>}, {pipeline_mode = #tpu.pipeline_mode<synchronous>, transform_indices = @transform_7, window_bounds = array<i64: 16, 96>}, {transform_indices = @transform_8, window_bounds = array<i64: 16, 8>}]} {
    %0 = tpu.iota {dimensions = array<i32: 0>} : vector<96x1xi32>
    %c24_i32 = arith.constant 24 : i32
    %c0_i32 = arith.constant 0 : i32
    %1 = arith.cmpi eq, %c24_i32, %c0_i32 : i32
    %c1_i32 = arith.constant 1 : i32
    %2 = arith.select %1, %c1_i32, %c24_i32 : i32
    %3 = vector.broadcast %2 : i32 to vector<96x1xi32>
    %4 = arith.remsi %0, %3 : vector<96x1xi32>
    %c0_i32_0 = arith.constant 0 : i32
    %5 = vector.broadcast %c0_i32_0 : i32 to vector<96x1xi32>
    %6 = arith.cmpi ne, %4, %5 : vector<96x1xi32>
    %c0_i32_1 = arith.constant 0 : i32
    %7 = vector.broadcast %c0_i32_1 : i32 to vector<96x1xi32>
    %8 = arith.cmpi slt, %4, %7 : vector<96x1xi32>
    %c0_i32_2 = arith.constant 0 : i32
    %9 = arith.cmpi slt, %2, %c0_i32_2 : i32
    %10 = vector.broadcast %9 : i1 to vector<96x1xi1>
    %11 = vector.broadcast %10 : vector<96x1xi1> to vector<96x1xi1>
    %12 = arith.xori %8, %11 : vector<96x1xi1>
    %13 = arith.andi %12, %6 : vector<96x1xi1>
    %14 = vector.broadcast %2 : i32 to vector<96x1xi32>
    %15 = arith.addi %4, %14 : vector<96x1xi32>
    %16 = arith.select %13, %15, %4 : vector<96x1xi1>, vector<96x1xi32>
    %c16_i32 = arith.constant 16 : i32
    %17 = vector.broadcast %c16_i32 : i32 to vector<96x1xi32>
    %18 = arith.cmpi slt, %16, %17 : vector<96x1xi32>
    %c0_i32_3 = arith.constant 0 : i32
    %19 = arith.cmpi eq, %arg0, %c0_i32_3 : i32
    %20 = arith.extui %19 : i1 to i32
    %c0_i32_4 = arith.constant 0 : i32
    %21 = arith.cmpi ne, %20, %c0_i32_4 : i32
    scf.if %21 {
      %c0 = arith.constant 0 : index
      %c0_7 = arith.constant 0 : index
      %25 = vector.load %arg2[%c0, %c0_7] : memref<96x4xbf16, #tpu.memory_space<vmem>>, vector<96x4xbf16>
      %cst = arith.constant 0.000000e+00 : bf16
      %26 = vector.broadcast %cst : bf16 to vector<2x4xbf16>
      %27 = tpu.concatenate %25, %26 in 0 : vector<96x4xbf16>, vector<2x4xbf16> -> vector<98x4xbf16>
      %28 = vector.extract_strided_slice %27 {offsets = [0, 0], sizes = [96, 4], strides = [1, 1]} : vector<98x4xbf16> to vector<96x4xbf16>
      %29 = vector.extract_strided_slice %27 {offsets = [1, 0], sizes = [96, 4], strides = [1, 1]} : vector<98x4xbf16> to vector<96x4xbf16>
      %30 = vector.extract_strided_slice %27 {offsets = [2, 0], sizes = [96, 4], strides = [1, 1]} : vector<98x4xbf16> to vector<96x4xbf16>
      %31 = tpu.concatenate %28, %29, %30 in 1 : vector<96x4xbf16>, vector<96x4xbf16>, vector<96x4xbf16> -> vector<96x12xbf16>
      %c0_8 = arith.constant 0 : index
      %c0_9 = arith.constant 0 : index
      %32 = vector.load %arg3[%c0_8, %c0_9] : memref<12x8xbf16, #tpu.memory_space<vmem>>, vector<12x8xbf16>
      %cst_10 = arith.constant dense<0.000000e+00> : vector<96x8xf32>
      %33 = tpu.matmul %31, %32, %cst_10 {dimension_numbers = #tpu.dot_dimension_numbers<[1], [0], [0], [1], [0, 0, 1, 1], [], []>} : vector<96x12xbf16>, vector<12x8xbf16>, vector<96x8xf32> -> vector<96x8xf32>
      %c0_11 = arith.constant 0 : index
      %c0_12 = arith.constant 0 : index
      %34 = vector.load %arg4[%c0_11, %c0_12] : memref<1x8xf32, #tpu.memory_space<vmem>>, vector<1x8xf32>
      %35 = vector.broadcast %34 : vector<1x8xf32> to vector<96x8xf32>
      %36 = arith.addf %33, %35 : vector<96x8xf32>
      %37 = arith.index_cast %arg1 : i32 to index
      %c0_13 = arith.constant 0 : index
      %c0_14 = arith.constant 0 : index
      %38 = vector.load %arg13[%37, %c0_13, %c0_14] : memref<2x96x8xf32, #tpu.memory_space<vmem>>, vector<1x96x8xf32>
      %39 = vector.shape_cast %38 : vector<1x96x8xf32> to vector<96x8xf32>
      %40 = vector.shape_cast %36 : vector<96x8xf32> to vector<1x96x8xf32>
      tpu.vector_store %arg13[%37, %c0_13, %c0_14], %40 {strides = array<i32>} : memref<2x96x8xf32, #tpu.memory_space<vmem>>, vector<1x96x8xf32>,
      %cst_15 = arith.constant 0.000000e+00 : f32
      %41 = vector.shape_cast %18 : vector<96x1xi1> to vector<96x1xi1>
      %42 = vector.broadcast %41 : vector<96x1xi1> to vector<96x8xi1>
      %43 = vector.broadcast %cst_15 : f32 to vector<96x8xf32>
      %44 = arith.select %42, %36, %43 : vector<96x8xi1>, vector<96x8xf32>
      %c0_i32_16 = arith.constant 0 : i32
      %45 = arith.cmpi eq, %arg1, %c0_i32_16 : i32
      %46 = arith.extui %45 : i1 to i32
      %c0_i32_17 = arith.constant 0 : i32
      %47 = arith.cmpi ne, %46, %c0_i32_17 : i32
      scf.if %47 {
        %cst_28 = arith.constant 0.000000e+00 : f32
        %59 = vector.broadcast %cst_28 : f32 to vector<1x8xf32>
        %c0_29 = arith.constant 0 : index
        %c0_30 = arith.constant 0 : index
        %60 = vector.load %arg11[%c0_29, %c0_30] : memref<1x8xf32, #tpu.memory_space<vmem>>, vector<1x8xf32>
        tpu.vector_store %arg11[%c0_29, %c0_30], %59 {strides = array<i32>} : memref<1x8xf32, #tpu.memory_space<vmem>>, vector<1x8xf32>,
        %cst_31 = arith.constant 0.000000e+00 : f32
        %61 = vector.broadcast %cst_31 : f32 to vector<1x8xf32>
        %c0_32 = arith.constant 0 : index
        %c0_33 = arith.constant 0 : index
        %62 = vector.load %arg12[%c0_32, %c0_33] : memref<1x8xf32, #tpu.memory_space<vmem>>, vector<1x8xf32>
        tpu.vector_store %arg12[%c0_32, %c0_33], %61 {strides = array<i32>} : memref<1x8xf32, #tpu.memory_space<vmem>>, vector<1x8xf32>,
      } else {
      }
      %c0_18 = arith.constant 0 : index
      %c0_19 = arith.constant 0 : index
      %48 = vector.load %arg11[%c0_18, %c0_19] : memref<1x8xf32, #tpu.memory_space<vmem>>, vector<1x8xf32>
      %cst_20 = arith.constant dense<0.000000e+00> : vector<8xf32>
      %49 = vector.multi_reduction <add>, %44, %cst_20 [0] : vector<96x8xf32> to vector<8xf32>
      %50 = vector.shape_cast %49 : vector<8xf32> to vector<1x8xf32>
      %51 = arith.addf %48, %50 : vector<1x8xf32>
      %c0_21 = arith.constant 0 : index
      %c0_22 = arith.constant 0 : index
      %52 = vector.load %arg11[%c0_21, %c0_22] : memref<1x8xf32, #tpu.memory_space<vmem>>, vector<1x8xf32>
      tpu.vector_store %arg11[%c0_21, %c0_22], %51 {strides = array<i32>} : memref<1x8xf32, #tpu.memory_space<vmem>>, vector<1x8xf32>,
      %c0_23 = arith.constant 0 : index
      %c0_24 = arith.constant 0 : index
      %53 = vector.load %arg12[%c0_23, %c0_24] : memref<1x8xf32, #tpu.memory_space<vmem>>, vector<1x8xf32>
      %54 = arith.mulf %44, %44 : vector<96x8xf32>
      %cst_25 = arith.constant dense<0.000000e+00> : vector<8xf32>
      %55 = vector.multi_reduction <add>, %54, %cst_25 [0] : vector<96x8xf32> to vector<8xf32>
      %56 = vector.shape_cast %55 : vector<8xf32> to vector<1x8xf32>
      %57 = arith.addf %53, %56 : vector<1x8xf32>
      %c0_26 = arith.constant 0 : index
      %c0_27 = arith.constant 0 : index
      %58 = vector.load %arg12[%c0_26, %c0_27] : memref<1x8xf32, #tpu.memory_space<vmem>>, vector<1x8xf32>
      tpu.vector_store %arg12[%c0_26, %c0_27], %57 {strides = array<i32>} : memref<1x8xf32, #tpu.memory_space<vmem>>, vector<1x8xf32>,
    } else {
    }
    %c1_i32_5 = arith.constant 1 : i32
    %22 = arith.cmpi eq, %arg0, %c1_i32_5 : i32
    %23 = arith.extui %22 : i1 to i32
    %c0_i32_6 = arith.constant 0 : i32
    %24 = arith.cmpi ne, %23, %c0_i32_6 : i32
    scf.if %24 {
      %25 = arith.index_cast %arg1 : i32 to index
      %c0 = arith.constant 0 : index
      %c0_7 = arith.constant 0 : index
      %26 = vector.load %arg13[%25, %c0, %c0_7] : memref<2x96x8xf32, #tpu.memory_space<vmem>>, vector<1x96x8xf32>
      %27 = vector.shape_cast %26 : vector<1x96x8xf32> to vector<96x8xf32>
      %c0_8 = arith.constant 0 : index
      %c0_9 = arith.constant 0 : index
      %28 = vector.load %arg11[%c0_8, %c0_9] : memref<1x8xf32, #tpu.memory_space<vmem>>, vector<1x8xf32>
      %cst = arith.constant 7.812500e-03 : f32
      %29 = vector.broadcast %cst : f32 to vector<1x8xf32>
      %30 = arith.mulf %28, %29 : vector<1x8xf32>
      %c0_10 = arith.constant 0 : index
      %c0_11 = arith.constant 0 : index
      %31 = vector.load %arg12[%c0_10, %c0_11] : memref<1x8xf32, #tpu.memory_space<vmem>>, vector<1x8xf32>
      %cst_12 = arith.constant 7.812500e-03 : f32
      %32 = vector.broadcast %cst_12 : f32 to vector<1x8xf32>
      %33 = arith.mulf %31, %32 : vector<1x8xf32>
      %34 = arith.mulf %30, %30 : vector<1x8xf32>
      %35 = arith.subf %33, %34 : vector<1x8xf32>
      %cst_13 = arith.constant 0.000000e+00 : f32
      %36 = vector.broadcast %cst_13 : f32 to vector<1x8xf32>
      %37 = arith.maximumf %35, %36 : vector<1x8xf32>
      %cst_14 = arith.constant 9.99999974E-6 : f32
      %38 = vector.broadcast %cst_14 : f32 to vector<1x8xf32>
      %39 = arith.addf %37, %38 : vector<1x8xf32>
      %40 = math.rsqrt %39 : vector<1x8xf32>
      %c0_15 = arith.constant 0 : index
      %c0_16 = arith.constant 0 : index
      %41 = vector.load %arg5[%c0_15, %c0_16] : memref<1x8xf32, #tpu.memory_space<vmem>>, vector<1x8xf32>
      %42 = arith.mulf %40, %41 : vector<1x8xf32>
      %c0_17 = arith.constant 0 : index
      %c0_18 = arith.constant 0 : index
      %43 = vector.load %arg6[%c0_17, %c0_18] : memref<1x8xf32, #tpu.memory_space<vmem>>, vector<1x8xf32>
      %44 = arith.mulf %30, %42 : vector<1x8xf32>
      %45 = arith.subf %43, %44 : vector<1x8xf32>
      %46 = vector.broadcast %42 : vector<1x8xf32> to vector<96x8xf32>
      %47 = arith.mulf %27, %46 : vector<96x8xf32>
      %48 = vector.broadcast %45 : vector<1x8xf32> to vector<96x8xf32>
      %49 = arith.addf %47, %48 : vector<96x8xf32>
      %cst_19 = arith.constant 0.000000e+00 : f32
      %50 = vector.broadcast %cst_19 : f32 to vector<96x8xf32>
      %51 = arith.maximumf %49, %50 : vector<96x8xf32>
      %cst_20 = arith.constant 0.000000e+00 : f32
      %52 = vector.shape_cast %18 : vector<96x1xi1> to vector<96x1xi1>
      %53 = vector.broadcast %52 : vector<96x1xi1> to vector<96x8xi1>
      %54 = vector.broadcast %cst_20 : f32 to vector<96x8xf32>
      %55 = arith.select %53, %51, %54 : vector<96x8xi1>, vector<96x8xf32>
      %cst_21 = arith.constant 0.000000e+00 : f32
      %56 = vector.broadcast %cst_21 : f32 to vector<1x8xf32>
      %cst_22 = arith.constant 0.000000e+00 : f32
      %57 = vector.broadcast %cst_22 : f32 to vector<1x8xf32>
      %58 = tpu.concatenate %56, %55, %57 in 0 : vector<1x8xf32>, vector<96x8xf32>, vector<1x8xf32> -> vector<98x8xf32>
      %59 = vector.extract_strided_slice %58 {offsets = [0, 0], sizes = [96, 8], strides = [1, 1]} : vector<98x8xf32> to vector<96x8xf32>
      %60 = vector.extract_strided_slice %58 {offsets = [1, 0], sizes = [96, 8], strides = [1, 1]} : vector<98x8xf32> to vector<96x8xf32>
      %61 = vector.extract_strided_slice %58 {offsets = [2, 0], sizes = [96, 8], strides = [1, 1]} : vector<98x8xf32> to vector<96x8xf32>
      %62 = tpu.concatenate %59, %60, %61 in 1 : vector<96x8xf32>, vector<96x8xf32>, vector<96x8xf32> -> vector<96x24xf32>
      %c0_23 = arith.constant 0 : index
      %c0_24 = arith.constant 0 : index
      %63 = vector.load %arg7[%c0_23, %c0_24] : memref<24x8xbf16, #tpu.memory_space<vmem>>, vector<24x8xbf16>
      %64 = arith.extf %63 : vector<24x8xbf16> to vector<24x8xf32>
      %cst_25 = arith.constant dense<0.000000e+00> : vector<96x8xf32>
      %65 = tpu.matmul %62, %64, %cst_25 {dimension_numbers = #tpu.dot_dimension_numbers<[1], [0], [0], [1], [0, 0, 1, 1], [], []>} : vector<96x24xf32>, vector<24x8xf32>, vector<96x8xf32> -> vector<96x8xf32>
      %c0_26 = arith.constant 0 : index
      %c0_27 = arith.constant 0 : index
      %66 = vector.load %arg8[%c0_26, %c0_27] : memref<1x8xf32, #tpu.memory_space<vmem>>, vector<1x8xf32>
      %67 = vector.broadcast %66 : vector<1x8xf32> to vector<96x8xf32>
      %68 = arith.addf %65, %67 : vector<96x8xf32>
      %cst_28 = arith.constant 0.000000e+00 : f32
      %69 = vector.broadcast %cst_28 : f32 to vector<96x8xf32>
      %70 = arith.maximumf %68, %69 : vector<96x8xf32>
      %c0_29 = arith.constant 0 : index
      %c0_30 = arith.constant 0 : index
      %71 = vector.load %arg9[%c0_29, %c0_30] : memref<16x96xf32, #tpu.memory_space<vmem>>, vector<16x96xf32>
      %cst_31 = arith.constant dense<0.000000e+00> : vector<16x8xf32>
      %72 = tpu.matmul %71, %70, %cst_31 {dimension_numbers = #tpu.dot_dimension_numbers<[1], [0], [0], [1], [0, 0, 1, 1], [], []>} : vector<16x96xf32>, vector<96x8xf32>, vector<16x8xf32> -> vector<16x8xf32>
      %c0_32 = arith.constant 0 : index
      %c0_33 = arith.constant 0 : index
      %73 = vector.load %arg10[%c0_32, %c0_33] : memref<16x8xf32, #tpu.memory_space<vmem>>, vector<16x8xf32>
      tpu.vector_store %arg10[%c0_32, %c0_33], %72 {strides = array<i32>} : memref<16x8xf32, #tpu.memory_space<vmem>>, vector<16x8xf32>,
    } else {
    }
    return
  }
  func.func @transform_0(%arg0: i32, %arg1: i32) -> (i32, i32) {
    %c1_i32 = arith.constant 1 : i32
    %0 = arith.subi %c1_i32, %arg0 : i32
    %1 = arith.muli %arg1, %0 : i32
    %c1_i32_0 = arith.constant 1 : i32
    %2 = arith.muli %c1_i32_0, %arg0 : i32
    %3 = arith.addi %1, %2 : i32
    %c0_i32 = arith.constant 0 : i32
    %c0_i32_1 = arith.constant 0 : i32
    return %3, %c0_i32 : i32, i32
  }
  func.func @transform_1(%arg0: i32, %arg1: i32) -> (i32, i32) {
    %c0_i32 = arith.constant 0 : i32
    %c0_i32_0 = arith.constant 0 : i32
    %c0_i32_1 = arith.constant 0 : i32
    return %c0_i32, %c0_i32_0 : i32, i32
  }
  func.func @transform_2(%arg0: i32, %arg1: i32) -> (i32, i32) {
    %c0_i32 = arith.constant 0 : i32
    %c0_i32_0 = arith.constant 0 : i32
    %c0_i32_1 = arith.constant 0 : i32
    return %c0_i32, %c0_i32_0 : i32, i32
  }
  func.func @transform_3(%arg0: i32, %arg1: i32) -> (i32, i32) {
    %c0_i32 = arith.constant 0 : i32
    %c0_i32_0 = arith.constant 0 : i32
    %c0_i32_1 = arith.constant 0 : i32
    return %c0_i32, %c0_i32_0 : i32, i32
  }
  func.func @transform_4(%arg0: i32, %arg1: i32) -> (i32, i32) {
    %c0_i32 = arith.constant 0 : i32
    %c0_i32_0 = arith.constant 0 : i32
    %c0_i32_1 = arith.constant 0 : i32
    return %c0_i32, %c0_i32_0 : i32, i32
  }
  func.func @transform_5(%arg0: i32, %arg1: i32) -> (i32, i32) {
    %c0_i32 = arith.constant 0 : i32
    %c0_i32_0 = arith.constant 0 : i32
    %c0_i32_1 = arith.constant 0 : i32
    return %c0_i32, %c0_i32_0 : i32, i32
  }
  func.func @transform_6(%arg0: i32, %arg1: i32) -> (i32, i32) {
    %c0_i32 = arith.constant 0 : i32
    %c0_i32_0 = arith.constant 0 : i32
    %c0_i32_1 = arith.constant 0 : i32
    return %c0_i32, %c0_i32_0 : i32, i32
  }
  func.func @transform_7(%arg0: i32, %arg1: i32) -> (i32, i32) {
    %c0_i32 = arith.constant 0 : i32
    %c0_i32_0 = arith.constant 0 : i32
    %c0_i32_1 = arith.constant 0 : i32
    return %c0_i32, %c0_i32_0 : i32, i32
  }
  func.func @transform_8(%arg0: i32, %arg1: i32) -> (i32, i32) {
    %0 = arith.muli %arg1, %arg0 : i32
    %c0_i32 = arith.constant 0 : i32
    %c0_i32_0 = arith.constant 0 : i32
    return %0, %c0_i32 : i32, i32
  }
}

</mosaic_0001>

<bundles_post_ra>
// kernel: block_forward.1
= control target key start
LH: loop header
LB: loop body
LE: loop exit
PB: predicated region body
PF: predicated region fallthrough
CT: control target
= control target key end

     0   :  { %s2978_s0 = inlined_call_operand.vmem [shape: bf16[192,4], index: 0, kind: input, shape index: {}]   ;;  %s2979_s1 = inlined_call_operand.vmem [shape: bf16[12,8], index: 1, kind: input, shape index: {}]   ;;  %s2980_s2 = inlined_call_operand.vmem [shape: f32[1,8], index: 2, kind: input, shape index: {}]   ;;  %s2981_s3 = inlined_call_operand.vmem [shape: f32[1,8], index: 3, kind: input, shape index: {}]   ;;  %s2982_s4 = inlined_call_operand.vmem [shape: f32[1,8], index: 4, kind: input, shape index: {}]   ;;  %s2983_s5 = inlined_call_operand.vmem [shape: bf16[24,8], index: 5, kind: input, shape index: {}]   ;;  %s2984_s6 = inlined_call_operand.vmem [shape: f32[1,8], index: 6, kind: input, shape index: {}]   ;;  %s2985_s7 = inlined_call_operand.vmem [shape: f32[16,96], index: 7, kind: input, shape index: {}]   ;;  %s2986_s8 = inlined_call_operand.hbm [shape: f32[32,8], index: 8, kind: output, shape index: {}]  }
   0x1   :  { %2987 = sst [smem:[#allocation8_spill]] %s2978_s0 }
   0x2   :  { %13 = vsyncpa [#allocation6], 0 }
   0x3   :  { %15 = vsyncpa [#allocation6 + $0x1], 0  ;;  %s2099_s27 = smov 0   ;;  %s2101_s28 = smov 0  }
   0x4   :  { %s2103_s29 = smov 0   ;;  %s2105_s30 = smov 0  }
   0x5   :  { %s2107_s9 = smov 0   ;;  %s2109_s10 = smov 0  }
   0x6   :  { %s2111_s11 = smov 0   ;;  %s2113_s12 = smov 0  }
   0x7 LB: > { %s1655_s13 = sadd.s32 4294967295, %s2043_s12   ;;  %s1656_s14 = sadd.s32 4294967294, %s2043_s12   ;;  %s2043_s12 = sphi %s2113_s12, %s21_s12   ;;  %s2039_s11 = sphi %s2111_s11, %s3050_s11   ;;  %s2035_s10 = sphi %s2109_s10, %s3049_s10   ;;  %s2031_s9 = sphi %s2107_s9, %s3048_s9   ;;  %s2027_s30 = sphi %s2105_s30, %s3047_s30   ;;  %s2023_s29 = sphi %s2103_s29, %s3046_s29   ;;  %s2019_s28 = sphi %s2101_s28, %s3045_s28   ;;  %s2015_s27 = sphi %s2099_s27, %s3044_s27  }
   0x8   : > { %s30_s15 = sadd.s32 1, %s2035_s10  ;;  %s33_s16 = sadd.s32 1, %s2039_s11 }
   0x9   : > { %p31_p0 = scmp.ge.s32.totalorder %s30_s15, 2  ;;  %s216_s17 = smul.u32 %s2035_s10, %s2039_s11 }
   0xa   : > { %p231_p1 = scmp.ne.s32.totalorder %s2023_s29, %s2019_s28  ;;  %p232_p2 = scmp.eq.s32.totalorder %s1655_s13, 3 }
   0xb   : > { %s3052_s15 = smov (%p31_p0, %s30_s15), 0  ;;  %s3054_s16 = smov (!%p31_p0, %s33_s16), %s2039_s11 }
   0xc   : > { %p237_p3 = scmp.ne.s32.totalorder %s2019_s28, %s2015_s27  ;;  %p35_p4 = scmp.ge.s32.totalorder %s3054_s16, 2 }
   0xd   : > { %p238_p5 = scmp.eq.s32.totalorder %s1656_s14, 3  ;;  %p2152_p6 = por %p232_p2, %p231_p1 }
   0xe   : > { %p1659_p7 = scmp.ge.s32.totalorder %s2043_s12, 1  ;;  %s3056_s16 = smov (%p35_p4, %s3054_s16), 0 }
   0xf   : > { %p2159_p8 = por %p238_p5, %p237_p3  ;;  %p292_p9 = scmp.lt.s32.totalorder %s2043_s12, 5 }
  0x10   : > { %s217_s20 = smul.u32 %s3056_s16, %s3052_s15  ;;  %s221_s22 = sadd.s32 1, %s2023_s29 }
  0x11   : > { %p293_p10 = pnand %p1659_p7, %p292_p9 }
  0x12   : > { %s218_s21 = ssub.s32 %s216_s17, %s217_s20  ;;  %s326_s24 = sand.u32 (!%p293_p10), 1, %s2019_s28   ;;  %v344_v0 = vlaneseq (!%p293_p10) }
  0x13   : > { %p219_p11 = scmp.eq.s32.totalorder %s218_s21, 0  ;;  %296 = sbr.rel (%p293_p10) target bundleno = 1127 (0x467), region = 52 }
  0x14   : > { %s329_s25 = ssub.s32 (!%p293_p10), 1, %s2031_s9  ;;  %s2174_s26 = sshll.u32 (!%p293_p10), %s326_s24, 4  ;;  %v2177_v1 = vshrl.u32 (!%p293_p10), %v344_v0, 7 }
  0x15   : > { %s2168_s23 = scalar_select %p219_p11, %s2023_s29, %s221_s22  }
  0x16   : > { %s330_s13 = smul.u32 (!%p293_p10), %s2027_s30, %s329_s25  ;;  %v346_v2 = vadd.s32 (!%p293_p10), 8, %v2177_v1  ;;  %v347_v3 = vadd.s32 (!%p293_p10), 16, %v2177_v1  ;;  %v348_v4 = vadd.s32 (!%p293_p10), 24, %v2177_v1  ;;  %v349_v5 = vadd.s32 (!%p293_p10), 32, %v2177_v1  ;;  %s2990_s0 = sld [smem:[#allocation8_spill]] (!%p293_p10) }
  0x17   : > { %v350_v6 = vadd.s32 (!%p293_p10), 40, %v2177_v1  ;;  %v351_v7 = vadd.s32 (!%p293_p10), 48, %v2177_v1  ;;  %v352_v8 = vadd.s32 (!%p293_p10), 56, %v2177_v1  ;;  %v353_v9 = vadd.s32 (!%p293_p10), 64, %v2177_v1  ;;  %p1662_p13 = scmp.ne.s32.totalorder (!%p293_p10), %s2031_s9, 0 }
  0x18   : > { %s331_s14 = sadd.s32 (!%p293_p10), %s2031_s9, %s330_s13  ;;  %v354_v10 = vadd.s32 (!%p293_p10), 72, %v2177_v1  ;;  %v2190_v11 = vadd.s32 (!%p293_p10), 80, %v2177_v1  ;;  %v2193_v12 = vadd.s32 (!%p293_p10), 88, %v2177_v1  ;;  %s2463_s13 = scalar_lea.vmem (!%p293_p10), [#allocation5], %s2174_s26 }
  0x19   : > { %s332_s17 = smul.u32 (!%p293_p10), 12, %s331_s14  ;;  %v2196_v13 = vmul.u32.u64.low (!%p293_p10), 2863311531, %v2177_v1  ;;  %v2197_v14 = vmul.u32.u64.high 2863311531, %v2177_v1, %v2196_v13  ;;  %v2199_v15 = vmul.u32.u64.low (!%p293_p10), 2863311531, %v346_v2  ;;  %v2200_v16 = vmul.u32.u64.high 2863311531, %v346_v2, %v2199_v15 }
  0x1a   : > { %v2202_v17 = vmul.u32.u64.low 2863311531, %v347_v3  ;;  %v2203_v18 = vmul.u32.u64.high 2863311531, %v347_v3, %v2202_v17  ;;  %v2205_v19 = vmul.u32.u64.low 2863311531, %v348_v4  ;;  %v2206_v20 = vmul.u32.u64.high 2863311531, %v348_v4, %v2205_v19  ;;  %s2045_s26 = smov (!%p1662_p13), 8   ;;  %s2046_s14 = smov (!%p1662_p13), 4  }
  0x1b   : > { %p333_p12 = scmp.lt.s32.totalorder %s332_s17, 23  ;;  %v2208_v21 = vmul.u32.u64.low 2863311531, %v349_v5  ;;  %v2209_v22 = vmul.u32.u64.high 2863311531, %v349_v5, %v2208_v21  ;;  %v2211_v23 = vmul.u32.u64.low 2863311531, %v350_v6  ;;  %v2212_v24 = vmul.u32.u64.high 2863311531, %v350_v6, %v2211_v23  ;;  %s837_s21 = smul.u32 (!%p1662_p13), 96, %s2027_s30 }
  0x1c   : > { %v2214_v25 = vmul.u32.u64.low 2863311531, %v351_v7  ;;  %v2215_v26 = vmul.u32.u64.high 2863311531, %v351_v7, %v2214_v25  ;;  %v2217_v27 = vmul.u32.u64.low 2863311531, %v352_v8  ;;  %v2218_v28 = vmul.u32.u64.high 2863311531, %v352_v8, %v2217_v27  ;;  %p1677_p0 = scmp.ne.s32.totalorder (!%p1662_p13), %s2027_s30, 0 }
  0x1d   : > { %s3058_s17 = smov (!%p333_p12, %s332_s17), 23  ;;  %v363_v29 = vshrl.u32 %v2197_v14, 4  ;;  %v374_v30 = vshrl.u32 %v2200_v16, 4  ;;  %v2227_v31 = vmul.u32.u64.low 2863311531, %v353_v9  ;;  %v2228_v32 = vmul.u32.u64.high 2863311531, %v353_v9, %v2227_v31 }
  0x1e   : > { %s1661_s20 = sshll.u32 %s3058_s17, 2  ;;  %v385_v33 = vshrl.u32 %v2203_v18, 4  ;;  %v396_v34 = vshrl.u32 %v2206_v20, 4  ;;  %v2232_v35 = vmul.u32.u64.low 2863311531, %v354_v10  ;;  %v2233_v36 = vmul.u32.u64.high 2863311531, %v354_v10, %v2232_v35 }
  0x1f   : > { %s2223_s25 = scalar_lea.vmem %s2990_s0, %s1661_s20  ;;  %v364_v37 = vmul.u32 24, %v363_v29  ;;  %v375_v38 = vmul.u32 24, %v374_v30  ;;  %v407_v39 = vshrl.u32 %v2209_v22, 4  ;;  %v418_v40 = vshrl.u32 %v2212_v24, 4 }
  0x20   : > { %v386_v41 = vmul.u32 24, %v385_v33  ;;  %v397_v42 = vmul.u32 24, %v396_v34  ;;  %v429_v43 = vshrl.u32 %v2215_v26, 4  ;;  %v440_v44 = vshrl.u32 %v2218_v28, 4  ;;  %v2497_v16 = vld [vmem:[%s2223_s25 + $0x8] sm:$0xff] (!%p1662_p13)  }
  0x21   : > { %v2240_v45 = vsub.s32 %v2177_v1, %v364_v37  ;;  %v2242_v46 = vsub.s32 %v346_v2, %v375_v38  ;;  %v408_v47 = vmul.u32 24, %v407_v39  ;;  %v419_v48 = vmul.u32 24, %v418_v40 }
  0x22   : > { %v2244_v49 = vsub.s32 %v347_v3, %v386_v41  ;;  %v2246_v50 = vsub.s32 %v348_v4, %v397_v42  ;;  %v430_v51 = vmul.u32 24, %v429_v43  ;;  %v441_v52 = vmul.u32 24, %v440_v44 }
  0x23   : > { %v2248_v53 = vsub.s32 %v349_v5, %v408_v47  ;;  %v2250_v54 = vsub.s32 %v350_v6, %v419_v48  ;;  %v451_v55 = vshrl.u32 %v2228_v32, 4  ;;  %v462_v56 = vshrl.u32 %v2233_v36, 4 }
  0x24   : > { %v2254_v57 = vsub.s32 %v351_v7, %v430_v51  ;;  %v2256_v58 = vsub.s32 %v352_v8, %v441_v52  ;;  %v2259_v59 = vmul.u32.u64.low 2863311531, %v2190_v11  ;;  %v2260_v60 = vmul.u32.u64.high 2863311531, %v2190_v11, %v2259_v59 }
  0x25   : > { %v452_v61 = vmul.u32 24, %v451_v55  ;;  %v463_v62 = vmul.u32 24, %v462_v56  ;;  %vm489_vm0 = vcmp.ne.s32.totalorder %v2240_v45, 0  ;;  %vm490_vm1 = vcmp.ne.s32.totalorder %v2242_v46, 0  ;;  %v2473_v59 = vld [vmem:[%s2223_s25 + $0x20] sm:$0xff] (!%p1662_p13)  }
  0x26   : > { %v2265_v63 = vmul.u32.u64.low 2863311531, %v2193_v12  ;;  %v2266_v0 = vmul.u32.u64.high 2863311531, %v2193_v12, %v2265_v63  ;;  %vm491_vm2 = vcmp.ne.s32.totalorder %v2244_v49, 0  ;;  %vm492_vm3 = vcmp.ne.s32.totalorder %v2246_v50, 0 }
  0x27   : > { %v2270_v2 = vsub.s32 %v353_v9, %v452_v61  ;;  %v2272_v3 = vsub.s32 %v354_v10, %v463_v62  ;;  %vm493_vm4 = vcmp.ne.s32.totalorder %v2248_v53, 0  ;;  %vm494_vm5 = vcmp.ne.s32.totalorder %v2250_v54, 0  ;;  %v2479_v63 = vld [vmem:[%s2223_s25 + $0x28] sm:$0xff] (!%p1662_p13)   ;;  %v2491_v9 = vld [vmem:[%s2223_s25] sm:$0xff] (!%p1662_p13)  }
  0x28   : > { %v473_v4 = vshrl.u32 %v2260_v60, 4  ;;  %vm501_vm8 = vcmp.lt.s32.totalorder %v2240_v45, 0  ;;  %vm502_vm11 = vcmp.lt.s32.totalorder %v2242_v46, 0  ;;  %vm503_vm12 = vcmp.lt.s32.totalorder %v2244_v49, 0 }
  0x29   : > { %vm2286_vm13 = vmand %vm501_vm8, %vm489_vm0  ;;  %v484_v7 = vshrl.u32 %v2266_v0, 4  ;;  %vm504_vm14 = vcmp.lt.s32.totalorder %v2246_v50, 0  ;;  %vm505_vm15 = vcmp.lt.s32.totalorder %v2248_v53, 0  ;;  %vm506_vm9 = vcmp.lt.s32.totalorder %v2250_v54, 0 }
  0x2a   : > { %v474_v6 = vmul.u32 24, %v473_v4  ;;  %vm2295_vm10 = vmand %vm502_vm11, %vm490_vm1  ;;  %vm507_vm0 = vcmp.lt.s32.totalorder %v2254_v57, 0  ;;  %vm508_vm8 = vcmp.lt.s32.totalorder %v2256_v58, 0  ;;  %vm510_vm1 = vcmp.lt.s32.totalorder %v2272_v3, 0 }
  0x2b   : > { %vm2305_vm6 = vmand %vm503_vm12, %vm491_vm2  ;;  %v485_v13 = vmul.u32 24, %v484_v7  ;;  %v525_v15 = vadd.s32 24, %v2240_v45  ;;  %v526_v17 = vadd.s32 24, %v2242_v46  ;;  %v528_v18 = vadd.s32 24, %v2246_v50 }
  0x2c   : > { %v475_v10 = vsub.s32 %v2190_v11, %v474_v6  ;;  %vm2313_vm11 = vmand %vm504_vm14, %vm492_vm3  ;;  %v527_v11 = vadd.s32 24, %v2244_v49  ;;  %v529_v19 = vadd.s32 24, %v2248_v53  ;;  %v530_v22 = vadd.s32 24, %v2250_v54 }
  0x2d   : > { %vm2320_vm7 = vmand %vm505_vm15, %vm493_vm4  ;;  %v486_v20 = vsub.s32 %v2193_v12, %v485_v13  ;;  %vm3003_vm12 = vcmp.ne.s32.totalorder %v2254_v57, 0  ;;  %v531_v12 = vadd.s32 24, %v2254_v57  ;;  %v532_v24 = vadd.s32 24, %v2256_v58 }
  0x2e   : > { %vm2333_vm4 = vmand %vm506_vm9, %vm494_vm5  ;;  %v533_v25 = vadd.s32 24, %v2270_v2  ;;  %v534_v26 = vadd.s32 24, %v2272_v3  ;;  %vm3006_vm15 = vcmp.ne.s32.totalorder %v2256_v58, 0  ;;  %v535_v28 = vadd.s32 24, %v475_v10 }
  0x2f   : > { %vm2342_vm14 = vmand %vm507_vm0, %vm3003_vm12  ;;  %vm500_vm5 = vcmp.ne.s32.totalorder %v486_v20, 0  ;;  %vm512_vm9 = vcmp.lt.s32.totalorder %v486_v20, 0  ;;  %v536_v29 = vadd.s32 24, %v486_v20  ;;  %vm3009_vm0 = vcmp.ne.s32.totalorder %v2270_v2, 0 }
  0x30   : > { %vm2354_vm3 = vmand %vm508_vm8, %vm3006_vm15  ;;  %vm3010_vm12 = vcmp.lt.s32.totalorder %v2270_v2, 0  ;;  %v537_v31 = vsel %vm2286_vm13, %v525_v15, %v2240_v45  ;;  %v538_v32 = vsel %vm2295_vm10, %v526_v17, %v2242_v46  ;;  %v539_v33 = vsel %vm2305_vm6, %v527_v11, %v2244_v49  ;;  %564 = sbr.rel (%p1662_p13) target bundleno = 458 (0x1ca), region = 56 }
  0x31   : > { %vm2362_vm2 = vmand %vm3010_vm12, %vm3009_vm0  ;;  %v540_v34 = vsel %vm2313_vm11, %v528_v18, %v2246_v50  ;;  %vm3013_vm8 = vcmp.ne.s32.totalorder %v2272_v3, 0  ;;  %v541_v36 = vsel %vm2320_vm7, %v529_v19, %v2248_v53  ;;  %v542_v37 = vsel %vm2333_vm4, %v530_v22, %v2250_v54 }
  0x32   : > { %vm2382_vm15 = vmand %vm510_vm1, %vm3013_vm8  ;;  %v543_v38 = vsel %vm2342_vm14, %v531_v12, %v2254_v57  ;;  %v544_v39 = vsel %vm2354_vm3, %v532_v24, %v2256_v58  ;;  %vm3016_vm6 = vcmp.ne.s32.totalorder %v475_v10, 0  ;;  %vm3017_vm10 = vcmp.lt.s32.totalorder %v475_v10, 0  ;;  %v2467_v57 = vld [vmem:[%s2223_s25 + $0x10] sm:$0xff] (!%p1662_p13)   ;;  %v2470_v58 = vld [vmem:[%s2223_s25 + $0x18] sm:$0xff] (!%p1662_p13)  }
  0x33   : > { %vm2400_vm13 = vmand %vm3017_vm10, %vm3016_vm6  ;;  %v545_v41 = vsel %vm2362_vm2, %v533_v25, %v2270_v2  ;;  %v546_v42 = vsel %vm2382_vm15, %v534_v26, %v2272_v3  ;;  %vm2410_vm7 = vcmp.lt.s32.totalorder %v537_v31, 16  ;;  %vm2414_vm1 = vcmp.lt.s32.totalorder %v538_v32, 16 }
  0x34   : > { %vm524_vm11 = vmand %vm512_vm9, %vm500_vm5  ;;  %v547_v45 = vsel %vm2400_vm13, %v535_v28, %v475_v10  ;;  %vm2422_vm2 = vcmp.lt.s32.totalorder %v539_v33, 16  ;;  %vm2426_vm3 = vcmp.lt.s32.totalorder %v540_v34, 16  ;;  %vm2430_vm4 = vcmp.lt.s32.totalorder %v541_v36, 16  ;;  %v1946_v28 = vld [vmem:[%s2979_s1] sm:$0x3f] (!%p1662_p13)  }
  0x35   : > { %v548_v49 = vsel %vm524_vm11, %v536_v29, %v486_v20  ;;  %vm2434_vm14 = vcmp.lt.s32.totalorder %v542_v37, 16  ;;  %vm2438_vm5 = vcmp.lt.s32.totalorder %v543_v38, 16  ;;  %vm2442_vm9 = vcmp.lt.s32.totalorder %v544_v39, 16 }
  0x36   : > { %vm2446_vm0 = vcmp.lt.s32.totalorder %v545_v41, 16  ;;  %vm2450_vm12 = vcmp.lt.s32.totalorder %v546_v42, 16  ;;  %vm2454_vm8 = vcmp.lt.s32.totalorder %v547_v45, 16  ;;  %vm2458_vm15 = vcmp.lt.s32.totalorder %v548_v49, 16 }
  0x37   : > { %vm673_vm6 = vcmask 1046528   ;;  %v677_v60 = vrot.slane %v2467_v57, 1  ;;  %v679_v61 = vrot.slane %v2470_v58, 1  ;;  %vm607_vm10 = vsmask.f32 7424 }
  0x38   : > { %v624_v62 = vshll.u32 %v2467_v57, 16  ;;  %v681_v0 = vrot.slane %v2473_v59, 1  ;;  %v628_v2 = vshrl.u32 %v2467_v57, 16  ;;  %v632_v3 = vshll.u32 %v2470_v58, 16 }
  0x39   : > { %v640_v4 = vshll.u32 %v2473_v59, 16  ;;  %v680_v5 = vsel %vm673_vm6, %v677_v60, %v679_v61  ;;  %v644_v7 = vshrl.u32 %v2473_v59, 16  ;;  %v648_v8 = vshll.u32 %v2479_v63, 16 }
  0x3a   : > { %v626_v6 = vrot.slane %v624_v62, 1  ;;  %691 = vrot.lane.b32.xlu1 %v680_v5, %s2045_s26  ;;  %v682_v10 = vsel %vm673_vm6, %v679_v61, %v681_v0  ;;  %v634_v13 = vrot.slane %v632_v3, 1  ;;  %v636_v15 = vshrl.u32 %v2470_v58, 16 }
  0x3b   : > { %v642_v14 = vrot.slane %v640_v4, 1  ;;  %v650_v11 = vrot.slane %v648_v8, 1  ;;  %v652_v18 = vshrl.u32 %v2479_v63, 16  ;;  %v609_v21 = vshrl.u32 %v2491_v9, 16 }
  0x3c   : > { %v630_v17 = vor.u32 %v628_v2, %v626_v6  ;;  %v638_v20 = vor.u32 %v636_v15, %v634_v13  ;;  %v611_v23 = vshll.u32 %v2491_v9, 16  ;;  %v616_v12 = vshll.u32 %v2497_v16, 16 }
  0x3d   : > { %v646_v19 = vor.u32 %v644_v7, %v642_v14  ;;  %v654_v25 = vor.u32 %v652_v18, %v650_v11  ;;  %v2047_v26 = vmov 0   ;;  %v620_v32 = vshrl.u32 %v2497_v16, 16 }
  0x3e   : > { %v635_v22 = vsel %vm607_vm10, %v630_v17, %v634_v13  ;;  %693 = vrot.lane.b32.xlu1 %v682_v10, %s2045_s26  ;;  %v658_v27 = vrot.slane %v2047_v26, 1  ;;  %v643_v29 = vsel %vm607_vm10, %v638_v20, %v642_v14  ;;  %v613_v30 = vrot.slane %v611_v23, 1 }
  0x3f   : > { %664 = vrot.lane.b32.xlu0 %v635_v22, %s2046_s14  ;;  %v651_v24 = vsel %vm607_vm10, %v646_v19, %v650_v11  ;;  %v618_v31 = vrot.slane %v616_v12, 1  ;;  %vm752_vm13 = vcmask 1045504   ;;  %v683_v37 = vrot.slane %v2479_v63, 1 }
  0x40   : > { %v614_v33 = vor.u32 %v613_v30, %v609_v21  ;;  %v754_v34 = vsel %vm752_vm13, %v1946_v28, 0  ;;  %v659_v35 = vsel %vm607_vm10, %v654_v25, %v658_v27  ;;  %1836 = vmatprep.subr.msk.bf16.mxu1 %vm752_vm13, %v1946_v28  ;;  %1835 = vmatprep.subr.msk.bf16.mxu0 %vm752_vm13, %v1946_v28  ;;  %v674_v41 = vrot.slane %v2491_v9, 1 }
  0x41   : > { %v622_v38 = vor.u32 %v620_v32, %v618_v31  ;;  %1834 = vmatpush3.bf16.msra.mxu1 %v754_v34  ;;  %1741 = vmatpush3.bf16.msra.mxu0 %v754_v34  ;;  %v684_v39 = vsel %vm673_vm6, %v681_v0, %v683_v37  ;;  %v675_v42 = vrot.slane %v2497_v16, 1  ;;  %v686_v45 = vsel %vm673_vm6, %v683_v37, %v658_v27 }
  0x42   : > { %668 = vrot.lane.b32.xlu1 %v651_v24, %s2046_s14  ;;  %v619_v36 = vsel %vm607_vm10, %v614_v33, %v618_v31  ;;  %vm699_vm11 = vcmask 31744   ;;  %vm739_vm13 = vcmask 97280  }
  0x43   : > { %666 = vrot.lane.b32.xlu0 %v643_v29, %s2046_s14  ;;  %v627_v40 = vsel %vm607_vm10, %v622_v38, %v626_v6  ;;  %v676_v49 = vsel %vm673_vm6, %v674_v41, %v675_v42  ;;  %v678_v61 = vsel %vm673_vm6, %v675_v42, %v677_v60  ;;  %vm712_vm10 = vcmask 64512  }
  0x44   : > { %vm891_vm6 = vcmask (!%p1677_p0), 57344  }
  0x46   : > { %670 = vrot.lane.b32.xlu1 %v659_v35, %s2046_s14 }
  0x47   : > { %660 = vrot.lane.b32.xlu0 %v619_v36, %s2046_s14 }
  0x4a   : > { %695 = vrot.lane.b32.xlu1 %v684_v39, %s2045_s26 }
  0x4b   : > { %662 = vrot.lane.b32.xlu0 %v627_v40, %s2046_s14 }
  0x4e   : > { %697 = vrot.lane.b32.xlu1 %v686_v45, %s2045_s26 }
  0x4f   : > { %687 = vrot.lane.b32.xlu0 %v676_v49, %s2045_s26 }
  0x53   : > { %689 = vrot.lane.b32.xlu0 %v678_v61, %s2045_s26  ;;  %s2561_s26 = scalar_lea.vmem [#allocation4], %s837_s21 }
  0xac   : > { %v692_v62 = vpop.permute.xlu1 %691 }
  0xb0   : > { %v694_v0 = vpop.permute.xlu1 %693 }
  0xb1   : > { %v665_v2 = vpop.permute.xlu0 %664 }
  0xb2   : > { %v705_v3 = vsel %vm699_vm11, %v2467_v57, %v665_v2 }
  0xb3   : > { %v718_v4 = vsel %vm712_vm10, %v705_v3, %v692_v62 }
  0xb4   : > { %1746 = vmatprep.mubr.msk.bf16.mxu1 %vm739_vm13, %v718_v4  ;;  %v669_v5 = vpop.permute.xlu1 %668 }
  0xb5   : > { %v667_v6 = vpop.permute.xlu0 %666  ;;  %v709_v13 = vsel %vm699_vm11, %v2473_v59, %v669_v5 }
  0xb6   : > { %v707_v60 = vsel %vm699_vm11, %v2470_v58, %v667_v6 }
  0xb7   : > { %v720_v7 = vsel %vm712_vm10, %v707_v60, %v694_v0 }
  0xb8   : > { %1747 = vmatmul.mubr.msk.bf16.vlgmr.msra.gmra.mrb[0].mxu1 %vm739_vm13, %v720_v7  ;;  %v671_v8 = vpop.permute.xlu1 %670 }
  0xb9   : > { %v661_v10 = vpop.permute.xlu0 %660  ;;  %v711_v17 = vsel %vm699_vm11, %v2479_v63, %v671_v8  ;;  %v1669_v63 = vld [vmem:[%s2980_s2] ss:$0 sm:$0xff] }
  0xba   : > { %v701_v58 = vsel %vm699_vm11, %v2491_v9, %v661_v10  ;;  %v2048_v10 = vmov (!%p1677_p0), 0.0  }
  0xbb   : > { %892 = vst.msk [vmem:[#allocation2] sm:$0x1] (!%p1677_p0), %vm891_vm6, %v2048_v10  ;;  %893 = vst.msk [vmem:[#allocation3] sm:$0x1] (!%p1677_p0), %vm891_vm6, %v2048_v10 }
  0xbc   : > { %v696_v14 = vpop.permute.xlu1 %695 }
  0xbd   : > { %v663_v57 = vpop.permute.xlu0 %662  ;;  %v722_v15 = vsel %vm712_vm10, %v709_v13, %v696_v14 }
  0xbe   : > { %1750 = vmatprep.mubr.msk.bf16.mxu1 %vm739_vm13, %v722_v15  ;;  %v703_v59 = vsel %vm699_vm11, %v2497_v16, %v663_v57 }
  0xc0   : > { %v698_v11 = vpop.permute.xlu1 %697 }
  0xc1   : > { %v688_v18 = vpop.permute.xlu0 %687  ;;  %v724_v19 = vsel %vm712_vm10, %v711_v17, %v698_v11 }
  0xc2   : > { %v714_v20 = vsel %vm712_vm10, %v701_v58, %v688_v18  ;;  %1751 = vmatmul.mubr.msk.bf16.gmra.mrb[4].mxu1 %vm739_vm13, %v724_v19 }
  0xc3   : > { %1742 = vmatprep.mubr.msk.bf16.mxu0 %vm739_vm13, %v714_v20 }
  0xc5   : > { %v690_v21 = vpop.permute.xlu0 %689 }
  0xc6   : > { %v716_v22 = vsel %vm712_vm10, %v703_v59, %v690_v21 }
  0xc7   : > { %1743 = vmatmul.mubr.msk.bf16.vlgmr.msra.gmra.mrb[0].mxu0 %vm739_vm13, %v716_v22 }
 0x18b   : > { %v1748_v9 = vpop.f32.mrb[0].mxu1 }
 0x18c   : > { %v815_v23 = vadd.f32 %v1748_v9, %v1669_v63  ;;  %v806_v12 = vpop.f32.mrb[1].mxu1 }
 0x18d   : > { %v807_v24 = vadd.f32 %v1669_v63, %v806_v12  ;;  %v1749_v25 = vpop.f32.mrb[2].mxu1 }
 0x18e   : > { %845 = vst.msk [vmem:[%s2561_s26 + $0x30] sm:$0xff] %vm712_vm10, %v815_v23  ;;  %v2567_v16 = vsel %vm2438_vm5, %v815_v23, 0.0  ;;  %v818_v26 = vadd.f32 %v1749_v25, %v1669_v63  ;;  %v809_v27 = vpop.f32.mrb[3].mxu1 }
 0x18f   : > { %843 = vst.msk [vmem:[%s2561_s26 + $0x20] sm:$0xff] %vm712_vm10, %v807_v24  ;;  %v879_v28 = vsel %vm2430_vm4, %v807_v24, 0.0  ;;  %v810_v29 = vadd.f32 %v1669_v63, %v809_v27 }
 0x190   : > { %846 = vst.msk [vmem:[%s2561_s26 + $0x38] sm:$0xff] %vm712_vm10, %v818_v26  ;;  %v2577_v30 = vsel %vm2442_vm9, %v818_v26, 0.0 }
 0x191   : > { %844 = vst.msk [vmem:[%s2561_s26 + $0x28] sm:$0xff] %vm712_vm10, %v810_v29  ;;  %v880_v31 = vsel %vm2434_vm14, %v810_v29, 0.0 }
 0x195   : > { %v1752_v32 = vpop.f32.mrb[4].mxu1 }
 0x196   : > { %v831_v33 = vadd.f32 %v1752_v32, %v1669_v63  ;;  %v822_v34 = vpop.f32.mrb[5].mxu1 }
 0x197   : > { %v823_v35 = vadd.f32 %v1669_v63, %v822_v34  ;;  %v1753_v36 = vpop.f32.mrb[6].mxu1 }
 0x198   : > { %849 = vst.msk [vmem:[%s2561_s26 + $0x50] sm:$0xff] %vm712_vm10, %v831_v33  ;;  %v2587_v37 = vsel %vm2454_vm8, %v831_v33, 0.0  ;;  %v834_v38 = vadd.f32 %v1753_v36, %v1669_v63  ;;  %v825_v39 = vpop.f32.mrb[7].mxu1 }
 0x199   : > { %847 = vst.msk [vmem:[%s2561_s26 + $0x40] sm:$0xff] %vm712_vm10, %v823_v35  ;;  %v2593_v40 = vsel %vm2446_vm0, %v823_v35, 0.0  ;;  %v826_v41 = vadd.f32 %v1669_v63, %v825_v39 }
 0x19a   : > { %v1744_v42 = vpop.f32.mrb[0].mxu0  ;;  %850 = vst.msk [vmem:[%s2561_s26 + $0x58] sm:$0xff] %vm712_vm10, %v834_v38  ;;  %v2599_v45 = vsel %vm2458_vm15, %v834_v38, 0.0  ;;  %890 = sbr.rel (%p1677_p0) target bundleno = 417 (0x1a1), region = 60 }
 0x19b   : > { %v799_v49 = vadd.f32 %v1744_v42, %v1669_v63  ;;  %v790_v61 = vpop.f32.mrb[1].mxu0  ;;  %848 = vst.msk [vmem:[%s2561_s26 + $0x48] sm:$0xff] %vm712_vm10, %v826_v41  ;;  %v884_v62 = vsel %vm2450_vm12, %v826_v41, 0.0 }
 0x19c   : > { %v791_v0 = vadd.f32 %v1669_v63, %v790_v61  ;;  %v1745_v2 = vpop.f32.mrb[2].mxu0 }
 0x19d   : > { %841 = vst.msk [vmem:[%s2561_s26 + $0x10] sm:$0xff] %vm712_vm10, %v799_v49  ;;  %v877_v3 = vsel %vm2422_vm2, %v799_v49, 0.0  ;;  %v802_v4 = vadd.f32 %v1745_v2, %v1669_v63  ;;  %v793_v5 = vpop.f32.mrb[3].mxu0 }
 0x19e   : > { %839 = vst.msk [vmem:[%s2561_s26] sm:$0xff] %vm712_vm10, %v791_v0  ;;  %v875_v6 = vsel %vm2410_vm7, %v791_v0, 0.0  ;;  %v794_v60 = vadd.f32 %v1669_v63, %v793_v5 }
 0x19f   : > { %842 = vst.msk [vmem:[%s2561_s26 + $0x18] sm:$0xff] %vm712_vm10, %v802_v4  ;;  %v878_v7 = vsel %vm2426_vm3, %v802_v4, 0.0 }
 0x1a0   : > { %840 = vst.msk [vmem:[%s2561_s26 + $0x8] sm:$0xff] %vm712_vm10, %v794_v60  ;;  %v876_v8 = vsel %vm2414_vm1, %v794_v60, 0.0 }
 0x1a1 PF: > { %v895_v13 = vsel %vm712_vm10, %v875_v6, 0.0  ;;  %v896_v14 = vsel %vm712_vm10, %v876_v8, 0.0  ;;  %v898_v57 = vsel %vm712_vm10, %v877_v3, 0.0  ;;  %v900_v17 = vsel %vm712_vm10, %v878_v7, 0.0 }
 0x1a2   : > { %v897_v15 = vadd.f32 %v896_v14, %v895_v13  ;;  %v928_v11 = vmul.f32 %v875_v6, %v875_v6  ;;  %v902_v18 = vsel %vm712_vm10, %v879_v28, 0.0  ;;  %v929_v19 = vmul.f32 %v876_v8, %v876_v8 }
 0x1a3   : > { %v930_v20 = vmul.f32 %v877_v3, %v877_v3  ;;  %v931_v21 = vmul.f32 %v878_v7, %v878_v7  ;;  %v904_v22 = vsel %vm712_vm10, %v880_v31, 0.0  ;;  %v932_v63 = vmul.f32 %v879_v28, %v879_v28 }
 0x1a4   : > { %v899_v58 = vadd.f32 %v898_v57, %v897_v15  ;;  %v940_v23 = vsel %vm712_vm10, %v928_v11, 0.0  ;;  %v941_v12 = vsel %vm712_vm10, %v929_v19, 0.0  ;;  %v906_v25 = vsel %vm712_vm10, %v2567_v16, 0.0 }
 0x1a5   : > { %v943_v24 = vsel %vm712_vm10, %v930_v20, 0.0  ;;  %v942_v26 = vadd.f32 %v941_v12, %v940_v23  ;;  %v933_v29 = vmul.f32 %v880_v31, %v880_v31  ;;  %v945_v32 = vsel %vm712_vm10, %v931_v21, 0.0 }
 0x1a6   : > { %v901_v59 = vadd.f32 %v900_v17, %v899_v58  ;;  %v908_v33 = vsel %vm712_vm10, %v2577_v30, 0.0  ;;  %v934_v35 = vmul.f32 %v2567_v16, %v2567_v16  ;;  %v947_v36 = vsel %vm712_vm10, %v932_v63, 0.0 }
 0x1a7   : > { %v944_v34 = vadd.f32 %v943_v24, %v942_v26  ;;  %v910_v38 = vsel %vm712_vm10, %v2593_v40, 0.0  ;;  %v935_v31 = vmul.f32 %v2577_v30, %v2577_v30  ;;  %v949_v42 = vsel %vm712_vm10, %v933_v29, 0.0 }
 0x1a8   : > { %v903_v9 = vadd.f32 %v902_v18, %v901_v59  ;;  %v912_v49 = vsel %vm712_vm10, %v884_v62, 0.0  ;;  %v936_v2 = vmul.f32 %v2593_v40, %v2593_v40  ;;  %v951_v16 = vsel %vm712_vm10, %v934_v35, 0.0 }
 0x1a9   : > { %v946_v39 = vadd.f32 %v945_v32, %v944_v34  ;;  %v914_v3 = vsel %vm712_vm10, %v2587_v37, 0.0  ;;  %v937_v6 = vmul.f32 %v884_v62, %v884_v62  ;;  %v953_v60 = vsel %vm712_vm10, %v935_v31, 0.0 }
 0x1aa   : > { %v905_v27 = vadd.f32 %v904_v22, %v903_v9  ;;  %v916_v30 = vsel %vm712_vm10, %v2599_v45, 0.0  ;;  %v938_v10 = vmul.f32 %v2587_v37, %v2587_v37  ;;  %v955_v40 = vsel %vm712_vm10, %v936_v2, 0.0  ;;  %v894_v9 = vld [vmem:[#allocation2] sm:$0x1] }
 0x1ab   : > { %v948_v61 = vadd.f32 %v947_v36, %v946_v39  ;;  %v939_v57 = vmul.f32 %v2599_v45, %v2599_v45  ;;  %v957_v15 = vsel %vm712_vm10, %v937_v6, 0.0  ;;  %vm925_vm11 = vcmask 57344  }
 0x1ac   : > { %v907_v28 = vadd.f32 %v906_v25, %v905_v27  ;;  %v959_v58 = vsel %vm712_vm10, %v938_v10, 0.0  ;;  %v927_v27 = vld [vmem:[#allocation3] sm:$0x1] }
 0x1ad   : > { %v950_v4 = vadd.f32 %v949_v42, %v948_v61  ;;  %v961_v19 = vsel %vm712_vm10, %v939_v57, 0.0 }
 0x1ae   : > { %v909_v41 = vadd.f32 %v908_v33, %v907_v28 }
 0x1af   : > { %v952_v7 = vadd.f32 %v951_v16, %v950_v4 }
 0x1b0   : > { %v911_v0 = vadd.f32 %v910_v38, %v909_v41 }
 0x1b1   : > { %v954_v13 = vadd.f32 %v953_v60, %v952_v7 }
 0x1b2   : > { %v913_v5 = vadd.f32 %v912_v49, %v911_v0 }
 0x1b3   : > { %v956_v62 = vadd.f32 %v955_v40, %v954_v13 }
 0x1b4   : > { %v915_v8 = vadd.f32 %v914_v3, %v913_v5 }
 0x1b5   : > { %v958_v11 = vadd.f32 %v957_v15, %v956_v62 }
 0x1b6   : > { %v917_v14 = vadd.f32 %v916_v30, %v915_v8 }
 0x1b7   : > { %v960_v20 = vadd.f32 %v959_v58, %v958_v11 }
 0x1b8   : > { %v918_v17 = vrot.slane %v917_v14, 4 }
 0x1b9   : > { %v962_v37 = vadd.f32 %v961_v19, %v960_v20 }
 0x1ba   : > { %v919_v18 = vadd.f32 %v918_v17, %v917_v14 }
 0x1bb   : > { %v963_v22 = vrot.slane %v962_v37, 4 }
 0x1bc   : > { %v920_v59 = vrot.slane %v919_v18, 2 }
 0x1bd   : > { %v964_v23 = vadd.f32 %v963_v22, %v962_v37 }
 0x1be   : > { %v921_v21 = vadd.f32 %v920_v59, %v919_v18 }
 0x1bf   : > { %v965_v45 = vrot.slane %v964_v23, 2 }
 0x1c0   : > { %v922_v63 = vrot.slane %v921_v21, 1 }
 0x1c1   : > { %v966_v25 = vadd.f32 %v965_v45, %v964_v23 }
 0x1c2   : > { %v923_v12 = vadd.f32 %v922_v63, %v921_v21 }
 0x1c3   : > { %v967_v26 = vrot.slane %v966_v25, 1 }
 0x1c4   : > { %v924_v24 = vadd.f32 %v923_v12, %v894_v9 }
 0x1c5   : > { %v968_v29 = vadd.f32 %v967_v26, %v966_v25 }
 0x1c6   : > { %926 = vst.msk [vmem:[#allocation2] sm:$0x1] %vm925_vm11, %v924_v24 }
 0x1c7   : > { %v969_v32 = vadd.f32 %v968_v29, %v927_v27 }
 0x1c9   : > { %970 = vst.msk [vmem:[#allocation3] sm:$0x1] %vm925_vm11, %v969_v32 }
 0x1ca PF: > { %p1678_p1 = scmp.ne.s32.totalorder %s2031_s9, 1 }
 0x1cb   : > { %s975_s14 = smul.u32 (!%p1678_p1), 96, %s2027_s30  ;;  %v998_v31 = vld [vmem:[%s2981_s3] sm:$0x1] (!%p1678_p1)  ;;  %v1006_v42 = vsub.s32 (!%p1678_p1), 0, %v2177_v1  ;;  %vm1099_vm10 = vcmask (!%p1678_p1), 1040384   ;;  %vm1202_vm13 = vcmask (!%p1678_p1), 1045504  }
 0x1cc   : > { %974 = sbr.rel (%p1678_p1) target bundleno = 1101 (0x44d), region = 64  ;;  %v1000_v2 = vld [vmem:[%s2982_s4] sm:$0x1] (!%p1678_p1)  ;;  %vm1140_vm6 = vcmask (!%p1678_p1), 1046528   ;;  %s2049_s17 = smov (!%p1678_p1), 16  }
 0x1cd   : > { %v989_v33 = vld [vmem:[#allocation2] sm:$0x1] (!%p1678_p1)  ;;  %s2667_s21 = scalar_lea.vmem (!%p1678_p1), [#allocation4], %s975_s14  ;;  %s2050_s20 = smov (!%p1678_p1), 8  }
 0x1ce   : > { %v990_v28 = vmul.f32 (!%p1678_p1), 0.0078125, %v989_v33  ;;  %v977_v61 = vld [vmem:[%s2667_s21] sm:$0xff] (!%p1678_p1)  ;;  %v978_v16 = vld [vmem:[%s2667_s21 + $0x8] sm:$0xff] (!%p1678_p1)  ;;  %v979_v3 = vld [vmem:[%s2667_s21 + $0x10] sm:$0xff] (!%p1678_p1) }
 0x1cf   : > { %v980_v1 = vld [vmem:[%s2667_s21 + $0x18] sm:$0xff] (!%p1678_p1)  ;;  %v981_v6 = vld [vmem:[%s2667_s21 + $0x20] sm:$0xff] (!%p1678_p1)  ;;  %v982_v60 = vld [vmem:[%s2667_s21 + $0x28] sm:$0xff] (!%p1678_p1) }
 0x1d0   : > { %v991_v34 = vld [vmem:[#allocation3] sm:$0x1] (!%p1678_p1)  ;;  %v993_v36 = vmul.f32 (!%p1678_p1), %v990_v28, %v990_v28  ;;  %v983_v30 = vld [vmem:[%s2667_s21 + $0x30] sm:$0xff] (!%p1678_p1)  ;;  %v984_v13 = vld [vmem:[%s2667_s21 + $0x38] sm:$0xff] (!%p1678_p1) }
 0x1d1   : > { %v992_v35 = vmul.f32 (!%p1678_p1), 0.0078125, %v991_v34  ;;  %v1701_v17 = vld [vmem:[%s2983_s5] sm:$0xff] (!%p1678_p1)  }
 0x1d2   : > { %1806 = vmatprep.subr.bf16.mxu0 (!%p1678_p1), %v1701_v17  ;;  %v985_v37 = vld [vmem:[%s2667_s21 + $0x40] sm:$0xff] (!%p1678_p1) }
 0x1d3   : > { %v994_v38 = vsub.f32 %v992_v35, %v993_v36  ;;  %1808 = vmatpush3.bf16.msra.mxu0 %v1701_v17 }
 0x1d5   : > { %v995_v39 = vmax.f32 %v994_v38, 0.0 }
 0x1d7   : > { %v996_v41 = vadd.f32 1e-05, %v995_v39 }
 0x1d9   : > { %1947 = vrsqrt.f32 %v996_v41 }
 0x1e3   : > { %v1948_v49 = vpop.eup %1947 }
 0x1e4   : > { %v999_v0 = vmul.f32 %v1948_v49, %v998_v31 }
 0x1e6   : > { %v1001_v4 = vmul.f32 %v999_v0, %v990_v28  ;;  %v2676_v5 = vrot.slane %v999_v0, %v1006_v42 }
 0x1e8   : > { %v1002_v7 = vsub.f32 %v1000_v2, %v1001_v4  ;;  %v1009_v8 = vmul.f32 %v2676_v5, %v977_v61  ;;  %v1010_v10 = vmul.f32 %v2676_v5, %v978_v16  ;;  %v1011_v40 = vmul.f32 %v2676_v5, %v979_v3 }
 0x1e9   : > { %v1012_v14 = vmul.f32 %v2676_v5, %v980_v1  ;;  %v1013_v57 = vmul.f32 %v2676_v5, %v981_v6  ;;  %v1014_v15 = vmul.f32 %v2676_v5, %v982_v60  ;;  %v1015_v62 = vmul.f32 %v2676_v5, %v983_v30  ;;  %v986_v30 = vld [vmem:[%s2667_s21 + $0x48] sm:$0xff] }
 0x1ea   : > { %v2692_v58 = vrot.slane %v1002_v7, %v1006_v42  ;;  %v1016_v11 = vmul.f32 %v2676_v5, %v984_v13  ;;  %v1017_v25 = vmul.f32 %v2676_v5, %v985_v37  ;;  %v987_v7 = vld [vmem:[%s2667_s21 + $0x50] sm:$0xff] }
 0x1ec   : > { %v1027_v18 = vadd.f32 %v2692_v58, %v1009_v8  ;;  %v1028_v19 = vadd.f32 %v2692_v58, %v1010_v10  ;;  %v1029_v20 = vadd.f32 %v2692_v58, %v1011_v40  ;;  %v1030_v59 = vadd.f32 %v2692_v58, %v1012_v14 }
 0x1ed   : > { %v1031_v21 = vadd.f32 %v2692_v58, %v1013_v57  ;;  %v1032_v22 = vadd.f32 %v2692_v58, %v1014_v15  ;;  %v1033_v63 = vadd.f32 %v2692_v58, %v1015_v62  ;;  %v1034_v26 = vadd.f32 %v2692_v58, %v1016_v11 }
 0x1ee   : > { %v1039_v9 = vmax.f32 %v1027_v18, 0.0  ;;  %v1040_v23 = vmax.f32 %v1028_v19, 0.0  ;;  %v1041_v12 = vmax.f32 %v1029_v20, 0.0  ;;  %v1042_v45 = vmax.f32 %v1030_v59, 0.0  ;;  %v1292_v20 = vld [vmem:[%s2983_s5 + $0x8] sm:$0xf] }
 0x1ef   : > { %v1043_v24 = vmax.f32 %v1031_v21, 0.0  ;;  %v1044_v41 = vmax.f32 %v1032_v22, 0.0  ;;  %v1045_v43 = vmax.f32 %v1033_v63, 0.0  ;;  %v1035_v47 = vadd.f32 %v2692_v58, %v1017_v25 }
 0x1f0   : > { %v1075_v27 = vsel %vm2410_vm7, %v1039_v9, 0.0  ;;  %v1076_v29 = vsel %vm2414_vm1, %v1040_v23, 0.0  ;;  %v1077_v32 = vsel %vm2422_vm2, %v1041_v12, 0.0  ;;  %v1078_v33 = vsel %vm2426_vm3, %v1042_v45, 0.0  ;;  %v988_v23 = vld [vmem:[%s2667_s21 + $0x58] sm:$0xff] }
 0x1f1   : > { %v1100_v34 = vrot.slane %v1075_v27, 7  ;;  %v1101_v28 = vrot.slane %v1076_v29, 7  ;;  %v1103_v35 = vrot.slane %v1077_v32, 7  ;;  %v1079_v36 = vsel %vm2430_vm4, %v1043_v24, 0.0 }
 0x1f2   : > { %v1105_v38 = vrot.slane %v1078_v33, 7  ;;  %v1107_v39 = vrot.slane %v1079_v36, 7  ;;  %v1080_v6 = vsel %vm2434_vm14, %v1044_v41, 0.0  ;;  %v1081_v60 = vsel %vm2438_vm5, %v1045_v43, 0.0 }
 0x1f3   : > { %v2716_v31 = vsel %vm1099_vm10, %v1100_v34, %v1101_v28  ;;  %v2719_v44 = vsel %vm1099_vm10, 0.0, %v1100_v34  ;;  %v2722_v46 = vsel %vm1099_vm10, %v1101_v28, %v1103_v35  ;;  %v1109_v13 = vrot.slane %v1080_v6, 7 }
 0x1f4   : > { %v1203_v42 = vrot.slane %v2719_v44, 2  ;;  %v1204_v48 = vrot.slane %v2716_v31, 2  ;;  %v1141_v49 = vrot.slane %v2719_v44, 1  ;;  %v1142_v61 = vrot.slane %v2716_v31, 1 }
 0x1f5   : > { %v1206_v0 = vrot.slane %v2722_v46, 2  ;;  %v1144_v2 = vrot.slane %v2722_v46, 1  ;;  %v2732_v16 = vsel %vm1099_vm10, %v1103_v35, %v1105_v38  ;;  %v2735_v3 = vsel %vm1099_vm10, %v1105_v38, %v1107_v39 }
 0x1f6   : > { %v1205_v1 = vsel %vm1202_vm13, %v1203_v42, %v1204_v48  ;;  %v1143_v4 = vsel %vm1140_vm6, %v1141_v49, %v1142_v61  ;;  %v1146_v40 = vrot.slane %v2732_v16, 1  ;;  %v1148_v50 = vrot.slane %v2735_v3, 1 }
 0x1f7   : > { %1228 = vrot.lane.b32.xlu1 %v1205_v1, %s2049_s17  ;;  %1166 = vrot.lane.b32.xlu0 %v1143_v4, %s2050_s20  ;;  %v1207_v8 = vsel %vm1202_vm13, %v1204_v48, %v1206_v0  ;;  %v1145_v10 = vsel %vm1140_vm6, %v1142_v61, %v1144_v2  ;;  %v1111_v14 = vrot.slane %v1081_v60, 7  ;;  %v1046_v51 = vmax.f32 %v1034_v26, 0.0 }
 0x1f8   : > { %v1047_v57 = vmax.f32 %v1035_v47, 0.0  ;;  %v1018_v15 = vmul.f32 %v2676_v5, %v986_v30  ;;  %v1019_v62 = vmul.f32 %v2676_v5, %v987_v7  ;;  %v1149_v17 = vsel %vm1140_vm6, %v1146_v40, %v1148_v50 }
 0x1f9   : > { %v1147_v11 = vsel %vm1140_vm6, %v1144_v2, %v1146_v40  ;;  %v1208_v18 = vrot.slane %v2732_v16, 2  ;;  %v1210_v19 = vrot.slane %v2735_v3, 2  ;;  %v2763_v59 = vsel %vm1099_vm10, %v1107_v39, %v1109_v13 }
 0x1fa   : > { %v2766_v37 = vsel %vm1099_vm10, %v1109_v13, %v1111_v14  ;;  %v1082_v21 = vsel %vm2442_vm9, %v1046_v51, 0.0  ;;  %v1083_v22 = vsel %vm2446_vm0, %v1047_v57, 0.0  ;;  %v1036_v63 = vadd.f32 %v2692_v58, %v1018_v15 }
 0x1fb   : > { %1230 = vrot.lane.b32.xlu1 %v1207_v8, %s2049_s17  ;;  %1168 = vrot.lane.b32.xlu0 %v1145_v10, %s2050_s20  ;;  %v1037_v9 = vadd.f32 %v2692_v58, %v1019_v62  ;;  %v1295_v12 = vunpack.c.l.bf16 %v1292_v20  ;;  %v1211_v45 = vsel %vm1202_vm13, %v1208_v18, %v1210_v19  ;;  %v1209_v24 = vsel %vm1202_vm13, %v1206_v0, %v1208_v18 }
 0x1fc   : > { %v1150_v52 = vrot.slane %v2763_v59, 1  ;;  %v1152_v25 = vrot.slane %v2766_v37, 1  ;;  %v1113_v53 = vrot.slane %v1082_v21, 7  ;;  %v1115_v26 = vrot.slane %v1083_v22, 7 }
 0x1fd   : > { %1758 = vmatprep.subr.mxu0 %v1295_v12  ;;  %v1048_v27 = vmax.f32 %v1036_v63, 0.0  ;;  %v1049_v29 = vmax.f32 %v1037_v9, 0.0  ;;  %v1020_v32 = vmul.f32 %v2676_v5, %v988_v23  ;;  %v1212_v28 = vrot.slane %v2763_v59, 2 }
 0x1fe   : > { %1759 = vmatpush3.msra.mxu0 %v1295_v12  ;;  %v1153_v33 = vsel %vm1140_vm6, %v1150_v52, %v1152_v25  ;;  %v1151_v34 = vsel %vm1140_vm6, %v1148_v50, %v1150_v52  ;;  %v1214_v35 = vrot.slane %v2766_v37, 2  ;;  %v2789_v36 = vsel %vm1099_vm10, %v1111_v14, %v1113_v53 }
 0x1ff   : > { %1172 = vrot.lane.b32.xlu1 %v1149_v17, %s2050_s20  ;;  %1170 = vrot.lane.b32.xlu0 %v1147_v11, %s2050_s20  ;;  %v2792_v38 = vsel %vm1099_vm10, %v1113_v53, %v1115_v26  ;;  %v1084_v5 = vsel %vm2450_vm12, %v1048_v27, 0.0  ;;  %v1085_v39 = vsel %vm2454_vm8, %v1049_v29, 0.0  ;;  %v1038_v41 = vadd.f32 %v2692_v58, %v1020_v32 }
 0x200   : > { %v1215_v43 = vsel %vm1202_vm13, %v1212_v28, %v1214_v35  ;;  %v1213_v47 = vsel %vm1202_vm13, %v1210_v19, %v1212_v28  ;;  %v1154_v42 = vrot.slane %v2789_v36, 1  ;;  %v1156_v48 = vrot.slane %v2792_v38, 1 }
 0x201   : > { %v1117_v49 = vrot.slane %v1084_v5, 7  ;;  %v1119_v54 = vrot.slane %v1085_v39, 7  ;;  %v1050_v61 = vmax.f32 %v1038_v41, 0.0  ;;  %v1216_v0 = vrot.slane %v2789_v36, 2 }
 0x202   : > { %v1157_v55 = vsel %vm1140_vm6, %v1154_v42, %v1156_v48  ;;  %v1155_v58 = vsel %vm1140_vm6, %v1152_v25, %v1154_v42  ;;  %v1218_v2 = vrot.slane %v2792_v38, 2  ;;  %vm1264_vm7 = vcmask 64512  }
 0x203   : > { %1234 = vrot.lane.b32.xlu1 %v1211_v45, %s2049_s17  ;;  %1232 = vrot.lane.b32.xlu0 %v1209_v24, %s2049_s17  ;;  %v2812_v1 = vsel %vm1099_vm10, %v1115_v26, %v1117_v49  ;;  %v2815_v4 = vsel %vm1099_vm10, %v1117_v49, %v1119_v54  ;;  %v1086_v6 = vsel %vm2458_vm15, %v1050_v61, 0.0  ;;  %v1217_v30 = vsel %vm1202_vm13, %v1214_v35, %v1216_v0 }
 0x204   : > { %v1219_v60 = vsel %vm1202_vm13, %v1216_v0, %v1218_v2  ;;  %v1158_v7 = vrot.slane %v2812_v1, 1  ;;  %v1160_v8 = vrot.slane %v2815_v4, 1  ;;  %v1121_v10 = vrot.slane %v1086_v6, 7 }
 0x205   : > { %v1220_v50 = vrot.slane %v2812_v1, 2  ;;  %v1222_v13 = vrot.slane %v2815_v4, 2  ;;  %vm1277_vm1 = vcmask 130048   ;;  %vm1303_vm2 = vcmask 195584  }
 0x206   : > { %v1161_v56 = vsel %vm1140_vm6, %v1158_v7, %v1160_v8  ;;  %v1159_v40 = vsel %vm1140_vm6, %v1156_v48, %v1158_v7  ;;  %v2832_v14 = vsel %vm1099_vm10, %v1119_v54, %v1121_v10  ;;  %v1137_v51 = vsel %vm1099_vm10, %v1121_v10, 0.0 }
 0x207   : > { %1176 = vrot.lane.b32.xlu1 %v1153_v33, %s2050_s20  ;;  %1174 = vrot.lane.b32.xlu0 %v1151_v34, %s2050_s20  ;;  %v1223_v57 = vsel %vm1202_vm13, %v1220_v50, %v1222_v13  ;;  %v1221_v15 = vsel %vm1202_vm13, %v1218_v2, %v1220_v50  ;;  %v1162_v62 = vrot.slane %v2832_v14, 1  ;;  %v1164_v17 = vrot.slane %v1137_v51, 1 }
 0x208   : > { %v1224_v19 = vrot.slane %v2832_v14, 2  ;;  %v1226_v20 = vrot.slane %v1137_v51, 2  ;;  %vm1479_vm3 = vcmask 785408  }
 0x209   : > { %v1165_v11 = vsel %vm1140_vm6, %v1162_v62, %v1164_v17  ;;  %v1163_v18 = vsel %vm1140_vm6, %v1160_v8, %v1162_v62 }
 0x20a   : > { %v1227_v21 = vsel %vm1202_vm13, %v1224_v19, %v1226_v20  ;;  %v1225_v22 = vsel %vm1202_vm13, %v1222_v13, %v1224_v19 }
 0x20b   : > { %1238 = vrot.lane.b32.xlu1 %v1215_v43, %s2049_s17  ;;  %1236 = vrot.lane.b32.xlu0 %v1213_v47, %s2049_s17 }
 0x20f   : > { %1180 = vrot.lane.b32.xlu1 %v1157_v55, %s2050_s20  ;;  %1178 = vrot.lane.b32.xlu0 %v1155_v58, %s2050_s20 }
 0x213   : > { %1242 = vrot.lane.b32.xlu1 %v1219_v60, %s2049_s17  ;;  %1240 = vrot.lane.b32.xlu0 %v1217_v30, %s2049_s17 }
 0x217   : > { %1184 = vrot.lane.b32.xlu1 %v1161_v56, %s2050_s20  ;;  %1182 = vrot.lane.b32.xlu0 %v1159_v40, %s2050_s20  ;;  %v1477_v40 = vld [vmem:[%s2985_s7] sm:$0xff] }
 0x218   : > { %1802 = vmatprep.mubr.msk.f32.mxu1 %vm1479_vm3, %v1477_v40 }
 0x21b   : > { %1246 = vrot.lane.b32.xlu1 %v1223_v57, %s2049_s17  ;;  %1244 = vrot.lane.b32.xlu0 %v1221_v15, %s2049_s17 }
 0x21f   : > { %1188 = vrot.lane.b32.xlu1 %v1165_v11, %s2050_s20  ;;  %1186 = vrot.lane.b32.xlu0 %v1163_v18, %s2050_s20 }
 0x223   : > { %1250 = vrot.lane.b32.xlu1 %v1227_v21, %s2049_s17  ;;  %1248 = vrot.lane.b32.xlu0 %v1225_v22, %s2049_s17 }
 0x269   : > { %v1229_v63 = vpop.permute.xlu1 %1228  ;;  %v1167_v9 = vpop.permute.xlu0 %1166 }
 0x26a   : > { %v1265_v23 = vsel %vm1264_vm7, %v2719_v44, %v1167_v9 }
 0x26b   : > { %v1278_v12 = vsel %vm1277_vm1, %v1265_v23, %v1229_v63 }
 0x26c   : > { %1760 = vmatprep.mubr.msk.f32.mxu0 %vm1303_vm2, %v1278_v12 }
 0x26d   : > { %v1231_v45 = vpop.permute.xlu1 %1230  ;;  %v1169_v24 = vpop.permute.xlu0 %1168 }
 0x26e   : > { %v1266_v52 = vsel %vm1264_vm7, %v2716_v31, %v1169_v24 }
 0x26f   : > { %v1279_v25 = vsel %vm1277_vm1, %v1266_v52, %v1231_v45 }
 0x270   : > { %1761 = vmatmul.mubr.msk.f32.vlgmr.msra.gmra.mrb[0].mxu0 %vm1303_vm2, %v1279_v25 }
 0x271   : > { %v1173_v53 = vpop.permute.xlu1 %1172  ;;  %v1171_v26 = vpop.permute.xlu0 %1170 }
 0x272   : > { %v1268_v27 = vsel %vm1264_vm7, %v2732_v16, %v1173_v53  ;;  %v1267_v44 = vsel %vm1264_vm7, %v2722_v46, %v1171_v26 }
 0x275   : > { %v1235_v29 = vpop.permute.xlu1 %1234  ;;  %v1233_v32 = vpop.permute.xlu0 %1232 }
 0x276   : > { %v1281_v33 = vsel %vm1277_vm1, %v1268_v27, %v1235_v29  ;;  %v1280_v34 = vsel %vm1277_vm1, %v1267_v44, %v1233_v32 }
 0x277   : > { %1763 = vmatprep.mubr.msk.f32.mxu0 %vm1303_vm2, %v1280_v34 }
 0x278   : > { %1764 = vmatmul.mubr.msk.f32.gmra.mrb[2].mxu0 %vm1303_vm2, %v1281_v33 }
 0x279   : > { %v1177_v31 = vpop.permute.xlu1 %1176  ;;  %v1175_v28 = vpop.permute.xlu0 %1174 }
 0x27a   : > { %v1270_v35 = vsel %vm1264_vm7, %v2763_v59, %v1177_v31  ;;  %v1269_v16 = vsel %vm1264_vm7, %v2735_v3, %v1175_v28 }
 0x27d   : > { %v1239_v5 = vpop.permute.xlu1 %1238  ;;  %v1237_v46 = vpop.permute.xlu0 %1236 }
 0x27e   : > { %v1283_v39 = vsel %vm1277_vm1, %v1270_v35, %v1239_v5  ;;  %v1282_v41 = vsel %vm1277_vm1, %v1269_v16, %v1237_v46 }
 0x27f   : > { %1766 = vmatprep.mubr.msk.f32.mxu0 %vm1303_vm2, %v1282_v41 }
 0x280   : > { %1767 = vmatmul.mubr.msk.f32.gmra.mrb[4].mxu0 %vm1303_vm2, %v1283_v39 }
 0x281   : > { %v1181_v43 = vpop.permute.xlu1 %1180  ;;  %v1179_v47 = vpop.permute.xlu0 %1178 }
 0x282   : > { %v1272_v42 = vsel %vm1264_vm7, %v2789_v36, %v1181_v43  ;;  %v1271_v59 = vsel %vm1264_vm7, %v2766_v37, %v1179_v47 }
 0x285   : > { %v1243_v48 = vpop.permute.xlu1 %1242  ;;  %v1241_v3 = vpop.permute.xlu0 %1240 }
 0x286   : > { %v1285_v49 = vsel %vm1277_vm1, %v1272_v42, %v1243_v48  ;;  %v1284_v54 = vsel %vm1277_vm1, %v1271_v59, %v1241_v3  ;;  %v1478_v48 = vld [vmem:[%s2985_s7 + $0x8] sm:$0xff] }
 0x287   : > { %1769 = vmatprep.mubr.msk.f32.mxu0 %vm1303_vm2, %v1284_v54 }
 0x288   : > { %1770 = vmatmul.mubr.msk.f32.gmra.mrb[6].mxu0 %vm1303_vm2, %v1285_v49 }
 0x289   : > { %v1185_v61 = vpop.permute.xlu1 %1184  ;;  %v1183_v55 = vpop.permute.xlu0 %1182 }
 0x28a   : > { %v1274_v58 = vsel %vm1264_vm7, %v2812_v1, %v1185_v61  ;;  %v1273_v36 = vsel %vm1264_vm7, %v2792_v38, %v1183_v55 }
 0x28d   : > { %v1247_v0 = vpop.permute.xlu1 %1246  ;;  %v1245_v37 = vpop.permute.xlu0 %1244 }
 0x28e   : > { %v1287_v2 = vsel %vm1277_vm1, %v1274_v58, %v1247_v0  ;;  %v1286_v6 = vsel %vm1277_vm1, %v1273_v36, %v1245_v37 }
 0x28f   : > { %1772 = vmatprep.mubr.msk.f32.mxu0 %vm1303_vm2, %v1286_v6 }
 0x290   : > { %1773 = vmatmul.mubr.msk.f32.gmra.mrb[8].mxu0 %vm1303_vm2, %v1287_v2 }
 0x291   : > { %v1189_v60 = vpop.permute.xlu1 %1188  ;;  %v1187_v30 = vpop.permute.xlu0 %1186 }
 0x292   : > { %v1276_v7 = vsel %vm1264_vm7, %v2832_v14, %v1189_v60  ;;  %v1275_v1 = vsel %vm1264_vm7, %v2815_v4, %v1187_v30  ;;  %v1679_v4 = vld [vmem:[%s2984_s6] ss:$0 sm:$0xff] }
 0x295   : > { %v1251_v8 = vpop.permute.xlu1 %1250  ;;  %v1249_v38 = vpop.permute.xlu0 %1248 }
 0x296   : > { %v1289_v10 = vsel %vm1277_vm1, %v1276_v7, %v1251_v8  ;;  %v1288_v56 = vsel %vm1277_vm1, %v1275_v1, %v1249_v38 }
 0x297   : > { %1775 = vmatprep.mubr.msk.f32.mxu0 %vm1303_vm2, %v1288_v56 }
 0x298   : > { %1776 = vmatmul.mubr.msk.f32.gmra.mrb[10].mxu0 %vm1303_vm2, %v1289_v10 }
 0x343   : > { %v1762_v50 = vpop.f32.mrb[0].mxu0 }
 0x344   : > { %v1412_v13 = vadd.f32 %v1762_v50, %v1679_v4  ;;  %v1406_v14 = vpop.f32.mrb[1].mxu0 }
 0x345   : > { %v1407_v51 = vadd.f32 %v1679_v4, %v1406_v14 }
 0x346   : > { %v1466_v57 = vmax.f32 %v1412_v13, 0.0 }
 0x347   : > { %v1465_v15 = vmax.f32 %v1407_v51, 0.0 }
 0x349   : > { %v1809_v62 = vpack.c.bf16 %v1466_v57, %v1465_v15 }
 0x34b   : > { %v1765_v17 = vpop.f32.mrb[2].mxu0  ;;  %1810 = vmatprep.subr.bf16.mxu1 %v1809_v62 }
 0x34c   : > { %v1422_v11 = vadd.f32 %v1765_v17, %v1679_v4  ;;  %v1416_v18 = vpop.f32.mrb[3].mxu0  ;;  %1812 = vmatpush3.bf16.msra.mxu1 %v1809_v62 }
 0x34d   : > { %v1417_v19 = vadd.f32 %v1679_v4, %v1416_v18 }
 0x34e   : > { %v1468_v20 = vmax.f32 %v1422_v11, 0.0 }
 0x34f   : > { %v1467_v21 = vmax.f32 %v1417_v19, 0.0 }
 0x351   : > { %v1813_v22 = vpack.c.bf16 %v1468_v20, %v1467_v21 }
 0x353   : > { %v1768_v63 = vpop.f32.mrb[4].mxu0  ;;  %1814 = vmatprep.subr.bf16.mxu1 %v1813_v22 }
 0x354   : > { %v1432_v9 = vadd.f32 %v1768_v63, %v1679_v4  ;;  %v1426_v23 = vpop.f32.mrb[5].mxu0  ;;  %1816 = vmatpush3.bf16.msra.mxu1 %v1813_v22 }
 0x355   : > { %v1427_v12 = vadd.f32 %v1679_v4, %v1426_v23 }
 0x356   : > { %v1470_v45 = vmax.f32 %v1432_v9, 0.0 }
 0x357   : > { %v1469_v24 = vmax.f32 %v1427_v12, 0.0 }
 0x359   : > { %v1817_v52 = vpack.c.bf16 %v1470_v45, %v1469_v24 }
 0x35b   : > { %v1771_v25 = vpop.f32.mrb[6].mxu0  ;;  %1818 = vmatprep.subr.bf16.mxu1 %v1817_v52 }
 0x35c   : > { %v1442_v53 = vadd.f32 %v1771_v25, %v1679_v4  ;;  %v1436_v26 = vpop.f32.mrb[7].mxu0  ;;  %1820 = vmatpush3.bf16.msra.mxu1 %v1817_v52 }
 0x35d   : > { %v1437_v27 = vadd.f32 %v1679_v4, %v1436_v26 }
 0x35e   : > { %v1472_v44 = vmax.f32 %v1442_v53, 0.0 }
 0x35f   : > { %v1471_v29 = vmax.f32 %v1437_v27, 0.0 }
 0x361   : > { %v1821_v32 = vpack.c.bf16 %v1472_v44, %v1471_v29 }
 0x363   : > { %v1774_v33 = vpop.f32.mrb[8].mxu0  ;;  %1822 = vmatprep.subr.bf16.mxu1 %v1821_v32 }
 0x364   : > { %v1452_v34 = vadd.f32 %v1774_v33, %v1679_v4  ;;  %v1446_v31 = vpop.f32.mrb[9].mxu0  ;;  %1824 = vmatpush3.bf16.msra.mxu1 %v1821_v32 }
 0x365   : > { %v1447_v28 = vadd.f32 %v1679_v4, %v1446_v31 }
 0x366   : > { %v1474_v35 = vmax.f32 %v1452_v34, 0.0 }
 0x367   : > { %v1473_v16 = vmax.f32 %v1447_v28, 0.0 }
 0x369   : > { %v1825_v5 = vpack.c.bf16 %v1474_v35, %v1473_v16 }
 0x36b   : > { %v1777_v46 = vpop.f32.mrb[10].mxu0  ;;  %1826 = vmatprep.subr.bf16.mxu1 %v1825_v5 }
 0x36c   : > { %v1462_v39 = vadd.f32 %v1777_v46, %v1679_v4  ;;  %v1456_v41 = vpop.f32.mrb[11].mxu0  ;;  %1828 = vmatpush3.bf16.msra.mxu1 %v1825_v5 }
 0x36d   : > { %v1457_v43 = vadd.f32 %v1679_v4, %v1456_v41 }
 0x36e   : > { %v1476_v47 = vmax.f32 %v1462_v39, 0.0 }
 0x36f   : > { %v1475_v42 = vmax.f32 %v1457_v43, 0.0 }
 0x371   : > { %v1829_v59 = vpack.c.bf16 %v1476_v47, %v1475_v42 }
 0x373   : > { %1830 = vmatprep.subr.bf16.mxu1 %v1829_v59 }
 0x374   : > { %1832 = vmatpush3.bf16.msra.mxu1 %v1829_v59 }
 0x377   : > { %1803 = vmatmul.mubr.msk.f32.vlgmr.msra.gmra.mrb[0].mxu1 %vm1479_vm3, %v1478_v48 }
 0x44a   : > { %v1804_v3 = vpop.f32.mrb[0].mxu1 }
 0x44b   : > { %1562 = vst.msk [vmem:[%s2463_s13 + $0x8] sm:$0xff] %vm1264_vm7, %v1804_v3  ;;  %v1552_v49 = vpop.f32.mrb[1].mxu1 }
 0x44c   : > { %1561 = vst.msk [vmem:[%s2463_s13] sm:$0xff] %vm1264_vm7, %v1552_v49 }
 0x44d PF: > { %s1571_s25 = smul.u32 %s2027_s30, %s2031_s9  ;;  %s1578_s21 = sshll.u32 %s2463_s13, 4  ;;  %s2917_s21 = int_to_ptr.vmem [resolvable:$true] %s1578_s21 }
 0x44e   : > { %s2926_s22 = scalar_lea.sflag [#allocation6], %s326_s24  ;;  %s1949_s0 = scalar_lea.vmem %s2917_s21, 256 }
 0x44f   : > { %s1699_s26 = sshll.u32 %s1571_s25, 8  ;;  %p1950_p2 = scmp.ne.s32.totalorder %s2917_s21, %s1949_s0 }
 0x450   : > { %s2922_s20 = scalar_lea.hbm %s2986_s8, %s1699_s26  ;;  %s2051_s30 = smov [#allocation5]  }
 0x451   : > { %p1951_p3 = pnand %p1950_p2, %p2152_p6  ;;  %s1953_s9 = sshll.u32 %s2051_s30, 4  ;;  %s1954_s9 = int_to_ptr.vmem [resolvable:$false] %s1953_s9 }
 0x452   : > { %s1955_s13 = scalar_lea.vmem %s1954_s9, 512  ;;  %p1956_p5 = scmp.lt.s32.totalorder %s2917_s21, %s1954_s9 }
 0x453   : > { %p1952_p4 = pneg %p1951_p3  ;;  %p1957_p7 = scmp.lt.s32.totalorder %s1955_s13, %s1949_s0 }
 0x455   : > { %p1958_p9 = por %p1957_p7, %p1956_p5 }
 0x457   : > { %p1959_p10 = pnand %p1958_p9, %p1952_p4 }
 0x459   : > { %1962 = shalt.err (!%p1959_p10)
}
 0x45a   : > { %s1963_s24 = scalar_lea.hbm %s2922_s20, 256  ;;  %s1967_s14 = scalar_lea.hbm %s2986_s8, 512 }
 0x45b   : > { %p1964_p11 = scmp.ne.s32.totalorder %s2922_s20, %s1963_s24  ;;  %p1968_p0 = scmp.lt.u32.totalorder %s2922_s20, %s2986_s8 }
 0x45c   : > { %p1969_p1 = scmp.lt.u32.totalorder %s1967_s14, %s1963_s24  ;;  %p1971_p3 = scmp.lt.u32.totalorder %s1963_s24, %s2922_s20 }
 0x45d   : > { %p1965_p12 = pnand %p1964_p11, %p2152_p6 }
 0x45e   : > { %p1970_p2 = por %p1969_p1, %p1968_p0 }
 0x45f   : > { %p1966_p13 = pneg %p1965_p12 }
 0x460   : > { %p1972_p4 = por %p1971_p3, %p1970_p2 }
 0x462   : > { %p1973_p5 = pnand %p1972_p4, %p1966_p13 }
 0x464   : > { %1976 = shalt.err (!%p1973_p5)
}
 0x465   : > { %s2052_s0 = smov 128   ;;  %s2053_s9 = smov 8  }
 0x466   : > { %1861 = dma.vmem_to_hbm [thread:$0]  (%p2152_p6), %s2917_s21, 256, %s2922_s20, %s2926_s22, %s2052_s0, %s2052_s0, %s2053_s9  }
 0x467 PF: > { %p1867_p7 = scmp.ge.s32.totalorder %s2043_s12, 2  ;;  %s1593_s13 = sand.u32 1, %s2015_s27  }
 0x468   : > { %s1594_s24 = scalar_lea.sflag [#allocation6], %s1593_s13 }
 0x469   : > { %p1864_p9 = pnand %p1867_p7, %p2159_p8 }
 0x46b   : > { %2010 = dma.done.wait (!%p1864_p9), %s1594_s24, 256  }
 0x46c   : > { %2012 = vsyncadd (!%p1864_p9), %s1594_s24, 4294967040  ;;  %s21_s12 = sadd.s32 1, %s2043_s12   ;;  %s3044_s27 = smov %s2019_s28 }
 0x46d   : > { %p18_p10 = scmp.ge.s32.totalorder %s21_s12, 6   ;;  %s3045_s28 = smov %s2023_s29 }
 0x46e   : > { %s3046_s29 = smov %s2168_s23  ;;  %s3047_s30 = smov %s2035_s10 }
 0x46f   : > { %s3048_s9 = smov %s2039_s11  ;;  %s3049_s10 = smov %s3052_s15 }
 0x470   : > { %s3050_s11 = smov %s3056_s16  ;;  %20 = sbr.rel (!%p18_p10) target bundleno = 7 (0x7), region = 101 }
 0x477   :  { %1599 = vsyncpa [#allocation6], 1 }
 0x478   :  { %1601 = vsyncpa [#allocation6 + $0x1], 1 }

</bundles_post_ra>
